<compile_context>
chip_gen: v7x
topology: tpu7x:2x2x1
jax: 0.10.0
libtpu: 0.0.40
codegen_flags: <defaults>
</compile_context>

<pallas_src>
import numpy as np
import jax
import jax.numpy as jnp
from jax import lax
from jax.experimental import pallas as pl
from jax.experimental.pallas import tpu as pltpu


# --------------------------- init-time packing utils --------------------------

def _stack_sections(sections, width):
    """Stack named (rows, width) blocks, padding each to a multiple of 8 rows.

    Returns (packed f32 array, {name: starting row, a static python int}).
    """
    offs, chunks, cur = {}, [], 0
    for name, arr in sections:
        arr = np.asarray(arr, np.float32)
        assert arr.ndim == 2 and arr.shape[1] == width, (name, arr.shape, width)
        pad = (-arr.shape[0]) % 8
        if pad:
            arr = np.concatenate([arr, np.zeros((pad, width), np.float32)], 0)
        offs[name] = cur
        chunks.append(arr)
        cur += arr.shape[0]
    return np.concatenate(chunks, 0), offs


def build_forward(input_dim, n_actions, raw):
    """Pack weights into the fused-kernel layout and return (forward_fn, params)."""
    C, Himg, Wimg = input_dim
    w1 = np.asarray(raw["conv1_w"], np.float32); b1 = np.asarray(raw["conv1_b"], np.float32)
    w2 = np.asarray(raw["conv2_w"], np.float32); b2 = np.asarray(raw["conv2_b"], np.float32)
    fc1_w = np.asarray(raw["fc1_w"], np.float32); fc1_b = np.asarray(raw["fc1_b"], np.float32)
    fc2_w = np.asarray(raw["fc2_w"], np.float32); fc2_b = np.asarray(raw["fc2_b"], np.float32)
    fc3_w = np.asarray(raw["fc3_w"], np.float32); fc3_b = np.asarray(raw["fc3_b"], np.float32)

    C1, K1 = w1.shape[0], w1.shape[2]          # 16, 3  (stride 2, pad 1)
    C2, K2 = w2.shape[0], w2.shape[2]          # 32, 5  (stride 1, pad 2)
    OH1 = (Himg + 2 - K1) // 2 + 1
    OW1 = (Wimg + 2 - K1) // 2 + 1
    PH1, PW1 = OH1 // 2, OW1 // 2
    OH2 = PH1 + 4 - K2 + 1
    OW2 = PW1 + 4 - K2 + 1
    PH2, PW2 = OH2 // 2, OW2 // 2
    NF = 128                                    # lane-padded logits width

    w_y1, w_h1 = OW1 * C1, PW1 * C1             # conv1 out / pooled lane widths
    w_y2, w_h2 = OW2 * C2, PW2 * C2             # conv2 out / pooled lane widths

    # Layout requirements of this (specialized) kernel.
    assert OH1 == 8 and Wimg % 8 == 0 and C * Himg == 64
    assert w_y1 == 128 and w_h1 == 64 and w_y2 == 128 and w_h2 == 64
    assert 0 < OH2 <= 8 and PH2 >= 1
    assert fc1_w.shape == (128, C2 * PH2 * PW2)
    assert fc2_w.shape == (64, 128) and fc3_w.shape[1] == 64 and n_actions <= NF

    # ---- conv1: vertical im2col selection (R1) + per-(ci,kh) horizontal fold (A1)
    R1 = np.zeros((C * K1 * OH1, C * Himg), np.float32)
    A1 = np.zeros((C * K1 * Wimg, w_y1), np.float32)
    for ci in range(C):
        for kh in range(K1):
            blk = ci * K1 + kh
            for oh in range(OH1):
                ih = 2 * oh + kh - 1
                if 0 <= ih < Himg:
                    R1[blk * OH1 + oh, ci * Himg + ih] = 1.0
            for ow in range(OW1):
                for kw in range(K1):
                    iw = 2 * ow + kw - 1
                    if 0 <= iw < Wimg:
                        A1[blk * Wimg + iw, ow * C1:(ow + 1) * C1] += w1[:, ci, kh, kw]
    b1_row = np.tile(b1, OW1)[None, :]                                   # (1, 128)

    # ---- pool1 horizontal (lane) max as +/- pair-selection matmuls
    Sc1 = np.zeros((w_y1, w_h1), np.float32)
    Dc1 = np.zeros((w_y1, w_h1), np.float32)
    for pw in range(PW1):
        for co in range(C1):
            for q in range(2):
                Sc1[(2 * pw + q) * C1 + co, pw * C1 + co] = 1.0
                Dc1[(2 * pw + q) * C1 + co, pw * C1 + co] = 1.0 if q == 0 else -1.0

    # ---- pool1 vertical max fused with conv2's vertical im2col selection
    #      (each kh block padded to 8 rows so all value slices stay 8-aligned)
    SR2 = np.zeros((K2 * 8, OH1), np.float32)
    DR2 = np.zeros((K2 * 8, OH1), np.float32)
    for kh in range(K2):
        for oh2 in range(OH2):
            ph = oh2 + kh - 2
            if 0 <= ph < PH1:
                r = kh * 8 + oh2
                SR2[r, 2 * ph] = 1.0; SR2[r, 2 * ph + 1] = 1.0
                DR2[r, 2 * ph] = 1.0; DR2[r, 2 * ph + 1] = -1.0

    # ---- conv2 horizontal fold (per kernel row kh)
    A2 = np.zeros((K2 * w_h1, w_y2), np.float32)
    for kh in range(K2):
        for pw in range(PW1):
            for ci in range(C1):
                for ow2 in range(OW2):
                    kw = pw - ow2 + 2
                    if 0 <= kw < K2:
                        A2[kh * w_h1 + pw * C1 + ci,
                           ow2 * C2:(ow2 + 1) * C2] += w2[:, ci, kh, kw]
    b2_row = np.tile(b2, OW2)[None, :]                                   # (1, 128)

    # ---- pool2 horizontal max
    Sc2 = np.zeros((w_y2, w_h2), np.float32)
    Dc2 = np.zeros((w_y2, w_h2), np.float32)
    for pw2 in range(PW2):
        for co in range(C2):
            for q in range(2):
                Sc2[(2 * pw2 + q) * C2 + co, pw2 * C2 + co] = 1.0
                Dc2[(2 * pw2 + q) * C2 + co, pw2 * C2 + co] = 1.0 if q == 0 else -1.0

    # ---- pool2 vertical row selectors (one per pooled output row)
    S3 = np.zeros((PH2, 8), np.float32)
    D3 = np.zeros((PH2, 8), np.float32)
    for r in range(PH2):
        S3[r, 2 * r] = 1.0; S3[r, 2 * r + 1] = 1.0
        D3[r, 2 * r] = 1.0; D3[r, 2 * r + 1] = -1.0

    # ---- fc1 with PyTorch's CHW flatten folded into the weights
    Wf1 = np.zeros((PH2 * w_h2, 128), np.float32)
    for r in range(PH2):
        for pw2 in range(PW2):
            for co in range(C2):
                Wf1[r * w_h2 + pw2 * C2 + co, :] = fc1_w[:, co * PH2 * PW2 + r * PW2 + pw2]

    # ---- fc2 / fc3 (fc3 zero-padded to 128 output lanes: lane-dense store)
    Wfc2 = fc2_w.T                                                        # (128, 64)
    Wfc3 = np.zeros((64, NF), np.float32)
    Wfc3[:, :n_actions] = fc3_w.T
    fb3_row = np.zeros((1, NF), np.float32)
    fb3_row[0, :n_actions] = fc3_b

    # ---- pack everything into 3 buffers (few big DMAs instead of 11+ small ones)
    wb128, o128 = _stack_sections([
        ("b1", b1_row), ("b2", b2_row), ("fb1", fc1_b[None, :]), ("fb3", fb3_row),
        ("A1", A1), ("A2", A2), ("Wf1", Wf1), ("Wfc3", Wfc3),
    ], 128)
    wb64, o64 = _stack_sections([
        ("fb2", fc2_b[None, :]), ("R1", R1), ("Sc1", Sc1), ("Dc1", Dc1),
        ("Sc2", Sc2), ("Dc2", Dc2), ("Wfc2", Wfc2),
    ], 64)
    wb8, o8 = _stack_sections([
        ("SR2", SR2), ("DR2", DR2), ("S3", S3), ("D3", D3),
    ], 8)

    n_blk1 = C * K1

    # ------------------------------- Pallas kernel -------------------------------
    def kernel(x_ref, wb128_ref, wb64_ref, wb8_ref, out_ref):
        f32 = jnp.float32
        x = x_ref[...]                                                   # (C*H, W)

        # conv1: vertical im2col selection, then one small matmul per (ci, kh).
        r1 = wb64_ref[o64["R1"]:o64["R1"] + n_blk1 * OH1, :]             # (96, 64)
        xsel1 = jnp.dot(r1, x, preferred_element_type=f32)               # (96, W)
        y1 = wb128_ref[o128["b1"]:o128["b1"] + 1, :]                     # bias (1,128)
        for b in range(n_blk1):
            lhs = xsel1[b * OH1:(b + 1) * OH1, :]                        # (8, W)
            rhs = wb128_ref[o128["A1"] + b * Wimg:
                            o128["A1"] + (b + 1) * Wimg, :]              # (W, 128)
            y1 = y1 + jnp.dot(lhs, rhs, preferred_element_type=f32)
        y1 = jnp.maximum(y1, 0.0)                                        # (8, 128)

        # pool1, horizontal half: max(a,b) = 0.5*((a+b)+|a-b|) via +/- matmuls.
        sc1 = wb64_ref[o64["Sc1"]:o64["Sc1"] + w_y1, :]
        dc1 = wb64_ref[o64["Dc1"]:o64["Dc1"] + w_y1, :]
        h1 = 0.5 * (jnp.dot(y1, sc1, preferred_element_type=f32)
                    + jnp.abs(jnp.dot(y1, dc1, preferred_element_type=f32)))   # (8, 64)

        # pool1 vertical half fused with conv2's vertical im2col selection.
        sr2 = wb8_ref[o8["SR2"]:o8["SR2"] + K2 * 8, :]                   # (40, 8)
        dr2 = wb8_ref[o8["DR2"]:o8["DR2"] + K2 * 8, :]
        xsel2 = 0.5 * (jnp.dot(sr2, h1, preferred_element_type=f32)
                       + jnp.abs(jnp.dot(dr2, h1, preferred_element_type=f32)))  # (40, 64)

        # conv2: one small matmul per kernel row kh.
        y2 = wb128_ref[o128["b2"]:o128["b2"] + 1, :]
        for kh in range(K2):
            lhs = xsel2[kh * 8:(kh + 1) * 8, :]                          # (8, 64)
            rhs = wb128_ref[o128["A2"] + kh * w_h1:
                            o128["A2"] + (kh + 1) * w_h1, :]             # (64, 128)
            y2 = y2 + jnp.dot(lhs, rhs, preferred_element_type=f32)
        y2 = jnp.maximum(y2, 0.0)                                        # (8, 128); rows OH2.. junk

        # pool2, horizontal half.
        sc2 = wb64_ref[o64["Sc2"]:o64["Sc2"] + w_y2, :]
        dc2 = wb64_ref[o64["Dc2"]:o64["Dc2"] + w_y2, :]
        h2 = 0.5 * (jnp.dot(y2, sc2, preferred_element_type=f32)
                    + jnp.abs(jnp.dot(y2, dc2, preferred_element_type=f32)))   # (8, 64)

        # pool2 vertical half fused with fc1 (CHW flatten folded into Wf1 rows).
        f1 = wb128_ref[o128["fb1"]:o128["fb1"] + 1, :]
        for r in range(PH2):
            s3 = wb8_ref[o8["S3"] + r:o8["S3"] + r + 1, :]               # (1, 8)
            d3 = wb8_ref[o8["D3"] + r:o8["D3"] + r + 1, :]
            p = 0.5 * (jnp.dot(s3, h2, preferred_element_type=f32)
                       + jnp.abs(jnp.dot(d3, h2, preferred_element_type=f32)))  # (1, 64)
            wr = wb128_ref[o128["Wf1"] + r * w_h2:
                           o128["Wf1"] + (r + 1) * w_h2, :]              # (64, 128)
            f1 = f1 + jnp.dot(p, wr, preferred_element_type=f32)
        f1 = jnp.maximum(f1, 0.0)                                        # (1, 128)

        # fc2 -> fc3 (fc3 zero-padded to 128 lanes => unmasked lane-dense store).
        wfc2 = wb64_ref[o64["Wfc2"]:o64["Wfc2"] + 128, :]                # (128, 64)
        fb2 = wb64_ref[o64["fb2"]:o64["fb2"] + 1, :]                     # (1, 64)
        f2 = jnp.maximum(jnp.dot(f1, wfc2, preferred_element_type=f32) + fb2, 0.0)
        wfc3 = wb128_ref[o128["Wfc3"]:o128["Wfc3"] + 64, :]              # (64, 128)
        fb3 = wb128_ref[o128["fb3"]:o128["fb3"] + 1, :]
        out_ref[...] = jnp.dot(f2, wfc3, preferred_element_type=f32) + fb3

    # --------------------------- pallas_call wrapper ------------------------------
    def _mm(m, k, n):
        return 2 * m * k * n

    flops = (_mm(n_blk1 * OH1, C * Himg, Wimg)
             + n_blk1 * _mm(OH1, Wimg, w_y1)
             + 2 * _mm(8, w_y1, w_h1)
             + 2 * _mm(K2 * 8, OH1, w_h1)
             + K2 * _mm(8, w_h1, w_y2)
             + 2 * _mm(8, w_y2, w_h2)
             + PH2 * (2 * _mm(1, 8, w_h2) + _mm(1, w_h2, 128))
             + _mm(1, 128, 64) + _mm(1, 64, NF))
    bytes_accessed = 4 * (C * Himg * Wimg + wb128.size + wb64.size + wb8.size + NF)

    call = pl.pallas_call(
        kernel,
        out_shape=jax.ShapeDtypeStruct((1, NF), jnp.float32),
        in_specs=[pl.BlockSpec(memory_space=pltpu.MemorySpace.VMEM)] * 4,
        out_specs=pl.BlockSpec(memory_space=pltpu.MemorySpace.VMEM),
        compiler_params=pltpu.CompilerParams(vmem_limit_bytes=32 * 1024 * 1024),
        cost_estimate=pl.CostEstimate(flops=flops, transcendentals=0,
                                      bytes_accessed=bytes_accessed),
    )

    params = {"wb128": jnp.asarray(wb128), "wb64": jnp.asarray(wb64),
              "wb8": jnp.asarray(wb8)}

    def forward(x_nchw, p):
        # torch.flatten(start_dim=0) before fc1 pins the batch size to 1.
        assert x_nchw.shape == (1, C, Himg, Wimg)
        x2d = x_nchw.reshape(C * Himg, Wimg)      # free CHW reshape, no transpose
        # Returns lane-padded (1, 128) logits; the [:n_actions] slice is deferred
        # to the consumer (avoids a tiny per-call XLA slice op).
        return call(x2d, p["wb128"], p["wb64"], p["wb8"])

    return forward, params


# ------------------------------ raw parameter init ----------------------------

def init_raw_params(key, input_dim, n_actions):
    c, h_in, w_in = input_dim
    ks = jax.random.split(key, 10)

    def u(k, shape, fan_in):
        bound = 1.0 / float(np.sqrt(fan_in))
        return jax.random.uniform(k, shape, jnp.float32, -bound, bound)

    ph1 = ((h_in - 1) // 2 + 1) // 2
    pw1 = ((w_in - 1) // 2 + 1) // 2
    ph2, pw2 = ph1 // 2, pw1 // 2
    feat = 32 * ph2 * pw2

    return dict(
        conv1_w=u(ks[0], (16, c, 3, 3), c * 9),
        conv1_b=u(ks[1], (16,), c * 9),
        conv2_w=u(ks[2], (32, 16, 5, 5), 16 * 25),
        conv2_b=u(ks[3], (32,), 16 * 25),
        fc1_w=u(ks[4], (128, feat), feat),
        fc1_b=u(ks[5], (128,), feat),
        fc2_w=u(ks[6], (64, 128), 128),
        fc2_b=u(ks[7], (64,), 128),
        fc3_w=u(ks[8], (n_actions, 64), 64),
        fc3_b=u(ks[9], (n_actions,), 64),
    )


# ------------------------------ pure-JAX reference ----------------------------

def reference_forward(x_nchw, raw):
    dn = ("NCHW", "OIHW", "NCHW")
    y = lax.conv_general_dilated(x_nchw, raw["conv1_w"], (2, 2), [(1, 1), (1, 1)],
                                 dimension_numbers=dn)
    y = jax.nn.relu(y + raw["conv1_b"][None, :, None, None])
    y = lax.reduce_window(y, -jnp.inf, lax.max, (1, 1, 2, 2), (1, 1, 2, 2), "VALID")
    y = lax.conv_general_dilated(y, raw["conv2_w"], (1, 1), [(2, 2), (2, 2)],
                                 dimension_numbers=dn)
    y = jax.nn.relu(y + raw["conv2_b"][None, :, None, None])
    y = lax.reduce_window(y, -jnp.inf, lax.max, (1, 1, 2, 2), (1, 1, 2, 2), "VALID")
    f = y.reshape(-1)
    f = jax.nn.relu(raw["fc1_w"] @ f + raw["fc1_b"])
    f = jax.nn.relu(raw["fc2_w"] @ f + raw["fc2_b"])
    return raw["fc3_w"] @ f + raw["fc3_b"]


# ----------------------------------- main --------------------------------------

if __name__ == "__main__":
    input_dim = (4, 16, 16)     # (C, H, W); batch must be 1 (flatten start_dim=0)
    n_actions = 6
    key = jax.random.PRNGKey(0)
    k_x, k_p = jax.random.split(key)

    state = jax.random.normal(k_x, (1,) + input_dim, jnp.float32)   # NCHW
    raw = init_raw_params(k_p, input_dim, n_actions)
    forward, params = build_forward(input_dim, n_actions, raw)

    fwd = jax.jit(forward)
    out_padded = jax.block_until_ready(fwd(state, params))          # (1, 128)
    out = out_padded[0, :n_actions]

    ref = reference_forward(state, raw)
    if not jnp.allclose(out, ref, atol=1e-4, rtol=1e-4):
        raise AssertionError(f"mismatch: pallas={out} ref={ref}")
    print("KERNEL_OK")
</pallas_src>

<mosaic_0001>
module attributes {stable_mosaic.version = 11 : i64} {
  func.func @kernel(%arg0: memref<64x16xf32, #tpu.memory_space<vmem>>, %arg1: memref<736x128xf32, #tpu.memory_space<vmem>>, %arg2: memref<744x64xf32, #tpu.memory_space<vmem>>, %arg3: memref<96x8xf32, #tpu.memory_space<vmem>>, %arg4: memref<1x128xf32, #tpu.memory_space<vmem>>) attributes {dimension_semantics = [], scalar_prefetch = 0 : i64, scratch_operands = 0 : i64, tpu.core_type = #tpu.core_type<tc>} {
    %c0 = arith.constant 0 : index
    %c0_0 = arith.constant 0 : index
    %0 = vector.load %arg0[%c0, %c0_0] : memref<64x16xf32, #tpu.memory_space<vmem>>, vector<64x16xf32>
    %c8 = arith.constant 8 : index
    %c0_1 = arith.constant 0 : index
    %1 = vector.load %arg2[%c8, %c0_1] : memref<744x64xf32, #tpu.memory_space<vmem>>, vector<96x64xf32>
    %cst = arith.constant dense<0.000000e+00> : vector<96x16xf32>
    %2 = tpu.matmul %1, %0, %cst {dimension_numbers = #tpu.dot_dimension_numbers<[1], [0], [0], [1], [0, 0, 1, 1], [], []>} : vector<96x64xf32>, vector<64x16xf32>, vector<96x16xf32> -> vector<96x16xf32>
    %c0_2 = arith.constant 0 : index
    %c0_3 = arith.constant 0 : index
    %3 = vector.load %arg1[%c0_2, %c0_3] : memref<736x128xf32, #tpu.memory_space<vmem>>, vector<1x128xf32>
    %4 = vector.extract_strided_slice %2 {offsets = [0, 0], sizes = [8, 16], strides = [1, 1]} : vector<96x16xf32> to vector<8x16xf32>
    %c32 = arith.constant 32 : index
    %c0_4 = arith.constant 0 : index
    %5 = vector.load %arg1[%c32, %c0_4] : memref<736x128xf32, #tpu.memory_space<vmem>>, vector<16x128xf32>
    %cst_5 = arith.constant dense<0.000000e+00> : vector<8x128xf32>
    %6 = tpu.matmul %4, %5, %cst_5 {dimension_numbers = #tpu.dot_dimension_numbers<[1], [0], [0], [1], [0, 0, 1, 1], [], []>} : vector<8x16xf32>, vector<16x128xf32>, vector<8x128xf32> -> vector<8x128xf32>
    %7 = vector.broadcast %3 : vector<1x128xf32> to vector<8x128xf32>
    %8 = arith.addf %7, %6 : vector<8x128xf32>
    %9 = vector.extract_strided_slice %2 {offsets = [8, 0], sizes = [8, 16], strides = [1, 1]} : vector<96x16xf32> to vector<8x16xf32>
    %c48 = arith.constant 48 : index
    %c0_6 = arith.constant 0 : index
    %10 = vector.load %arg1[%c48, %c0_6] : memref<736x128xf32, #tpu.memory_space<vmem>>, vector<16x128xf32>
    %cst_7 = arith.constant dense<0.000000e+00> : vector<8x128xf32>
    %11 = tpu.matmul %9, %10, %cst_7 {dimension_numbers = #tpu.dot_dimension_numbers<[1], [0], [0], [1], [0, 0, 1, 1], [], []>} : vector<8x16xf32>, vector<16x128xf32>, vector<8x128xf32> -> vector<8x128xf32>
    %12 = arith.addf %8, %11 : vector<8x128xf32>
    %13 = vector.extract_strided_slice %2 {offsets = [16, 0], sizes = [8, 16], strides = [1, 1]} : vector<96x16xf32> to vector<8x16xf32>
    %c64 = arith.constant 64 : index
    %c0_8 = arith.constant 0 : index
    %14 = vector.load %arg1[%c64, %c0_8] : memref<736x128xf32, #tpu.memory_space<vmem>>, vector<16x128xf32>
    %cst_9 = arith.constant dense<0.000000e+00> : vector<8x128xf32>
    %15 = tpu.matmul %13, %14, %cst_9 {dimension_numbers = #tpu.dot_dimension_numbers<[1], [0], [0], [1], [0, 0, 1, 1], [], []>} : vector<8x16xf32>, vector<16x128xf32>, vector<8x128xf32> -> vector<8x128xf32>
    %16 = arith.addf %12, %15 : vector<8x128xf32>
    %17 = vector.extract_strided_slice %2 {offsets = [24, 0], sizes = [8, 16], strides = [1, 1]} : vector<96x16xf32> to vector<8x16xf32>
    %c80 = arith.constant 80 : index
    %c0_10 = arith.constant 0 : index
    %18 = vector.load %arg1[%c80, %c0_10] : memref<736x128xf32, #tpu.memory_space<vmem>>, vector<16x128xf32>
    %cst_11 = arith.constant dense<0.000000e+00> : vector<8x128xf32>
    %19 = tpu.matmul %17, %18, %cst_11 {dimension_numbers = #tpu.dot_dimension_numbers<[1], [0], [0], [1], [0, 0, 1, 1], [], []>} : vector<8x16xf32>, vector<16x128xf32>, vector<8x128xf32> -> vector<8x128xf32>
    %20 = arith.addf %16, %19 : vector<8x128xf32>
    %21 = vector.extract_strided_slice %2 {offsets = [32, 0], sizes = [8, 16], strides = [1, 1]} : vector<96x16xf32> to vector<8x16xf32>
    %c96 = arith.constant 96 : index
    %c0_12 = arith.constant 0 : index
    %22 = vector.load %arg1[%c96, %c0_12] : memref<736x128xf32, #tpu.memory_space<vmem>>, vector<16x128xf32>
    %cst_13 = arith.constant dense<0.000000e+00> : vector<8x128xf32>
    %23 = tpu.matmul %21, %22, %cst_13 {dimension_numbers = #tpu.dot_dimension_numbers<[1], [0], [0], [1], [0, 0, 1, 1], [], []>} : vector<8x16xf32>, vector<16x128xf32>, vector<8x128xf32> -> vector<8x128xf32>
    %24 = arith.addf %20, %23 : vector<8x128xf32>
    %25 = vector.extract_strided_slice %2 {offsets = [40, 0], sizes = [8, 16], strides = [1, 1]} : vector<96x16xf32> to vector<8x16xf32>
    %c112 = arith.constant 112 : index
    %c0_14 = arith.constant 0 : index
    %26 = vector.load %arg1[%c112, %c0_14] : memref<736x128xf32, #tpu.memory_space<vmem>>, vector<16x128xf32>
    %cst_15 = arith.constant dense<0.000000e+00> : vector<8x128xf32>
    %27 = tpu.matmul %25, %26, %cst_15 {dimension_numbers = #tpu.dot_dimension_numbers<[1], [0], [0], [1], [0, 0, 1, 1], [], []>} : vector<8x16xf32>, vector<16x128xf32>, vector<8x128xf32> -> vector<8x128xf32>
    %28 = arith.addf %24, %27 : vector<8x128xf32>
    %29 = vector.extract_strided_slice %2 {offsets = [48, 0], sizes = [8, 16], strides = [1, 1]} : vector<96x16xf32> to vector<8x16xf32>
    %c128 = arith.constant 128 : index
    %c0_16 = arith.constant 0 : index
    %30 = vector.load %arg1[%c128, %c0_16] : memref<736x128xf32, #tpu.memory_space<vmem>>, vector<16x128xf32>
    %cst_17 = arith.constant dense<0.000000e+00> : vector<8x128xf32>
    %31 = tpu.matmul %29, %30, %cst_17 {dimension_numbers = #tpu.dot_dimension_numbers<[1], [0], [0], [1], [0, 0, 1, 1], [], []>} : vector<8x16xf32>, vector<16x128xf32>, vector<8x128xf32> -> vector<8x128xf32>
    %32 = arith.addf %28, %31 : vector<8x128xf32>
    %33 = vector.extract_strided_slice %2 {offsets = [56, 0], sizes = [8, 16], strides = [1, 1]} : vector<96x16xf32> to vector<8x16xf32>
    %c144 = arith.constant 144 : index
    %c0_18 = arith.constant 0 : index
    %34 = vector.load %arg1[%c144, %c0_18] : memref<736x128xf32, #tpu.memory_space<vmem>>, vector<16x128xf32>
    %cst_19 = arith.constant dense<0.000000e+00> : vector<8x128xf32>
    %35 = tpu.matmul %33, %34, %cst_19 {dimension_numbers = #tpu.dot_dimension_numbers<[1], [0], [0], [1], [0, 0, 1, 1], [], []>} : vector<8x16xf32>, vector<16x128xf32>, vector<8x128xf32> -> vector<8x128xf32>
    %36 = arith.addf %32, %35 : vector<8x128xf32>
    %37 = vector.extract_strided_slice %2 {offsets = [64, 0], sizes = [8, 16], strides = [1, 1]} : vector<96x16xf32> to vector<8x16xf32>
    %c160 = arith.constant 160 : index
    %c0_20 = arith.constant 0 : index
    %38 = vector.load %arg1[%c160, %c0_20] : memref<736x128xf32, #tpu.memory_space<vmem>>, vector<16x128xf32>
    %cst_21 = arith.constant dense<0.000000e+00> : vector<8x128xf32>
    %39 = tpu.matmul %37, %38, %cst_21 {dimension_numbers = #tpu.dot_dimension_numbers<[1], [0], [0], [1], [0, 0, 1, 1], [], []>} : vector<8x16xf32>, vector<16x128xf32>, vector<8x128xf32> -> vector<8x128xf32>
    %40 = arith.addf %36, %39 : vector<8x128xf32>
    %41 = vector.extract_strided_slice %2 {offsets = [72, 0], sizes = [8, 16], strides = [1, 1]} : vector<96x16xf32> to vector<8x16xf32>
    %c176 = arith.constant 176 : index
    %c0_22 = arith.constant 0 : index
    %42 = vector.load %arg1[%c176, %c0_22] : memref<736x128xf32, #tpu.memory_space<vmem>>, vector<16x128xf32>
    %cst_23 = arith.constant dense<0.000000e+00> : vector<8x128xf32>
    %43 = tpu.matmul %41, %42, %cst_23 {dimension_numbers = #tpu.dot_dimension_numbers<[1], [0], [0], [1], [0, 0, 1, 1], [], []>} : vector<8x16xf32>, vector<16x128xf32>, vector<8x128xf32> -> vector<8x128xf32>
    %44 = arith.addf %40, %43 : vector<8x128xf32>
    %45 = vector.extract_strided_slice %2 {offsets = [80, 0], sizes = [8, 16], strides = [1, 1]} : vector<96x16xf32> to vector<8x16xf32>
    %c192 = arith.constant 192 : index
    %c0_24 = arith.constant 0 : index
    %46 = vector.load %arg1[%c192, %c0_24] : memref<736x128xf32, #tpu.memory_space<vmem>>, vector<16x128xf32>
    %cst_25 = arith.constant dense<0.000000e+00> : vector<8x128xf32>
    %47 = tpu.matmul %45, %46, %cst_25 {dimension_numbers = #tpu.dot_dimension_numbers<[1], [0], [0], [1], [0, 0, 1, 1], [], []>} : vector<8x16xf32>, vector<16x128xf32>, vector<8x128xf32> -> vector<8x128xf32>
    %48 = arith.addf %44, %47 : vector<8x128xf32>
    %49 = vector.extract_strided_slice %2 {offsets = [88, 0], sizes = [8, 16], strides = [1, 1]} : vector<96x16xf32> to vector<8x16xf32>
    %c208 = arith.constant 208 : index
    %c0_26 = arith.constant 0 : index
    %50 = vector.load %arg1[%c208, %c0_26] : memref<736x128xf32, #tpu.memory_space<vmem>>, vector<16x128xf32>
    %cst_27 = arith.constant dense<0.000000e+00> : vector<8x128xf32>
    %51 = tpu.matmul %49, %50, %cst_27 {dimension_numbers = #tpu.dot_dimension_numbers<[1], [0], [0], [1], [0, 0, 1, 1], [], []>} : vector<8x16xf32>, vector<16x128xf32>, vector<8x128xf32> -> vector<8x128xf32>
    %52 = arith.addf %48, %51 : vector<8x128xf32>
    %cst_28 = arith.constant 0.000000e+00 : f32
    %53 = vector.broadcast %cst_28 : f32 to vector<8x128xf32>
    %54 = arith.maximumf %52, %53 : vector<8x128xf32>
    %c104 = arith.constant 104 : index
    %c0_29 = arith.constant 0 : index
    %55 = vector.load %arg2[%c104, %c0_29] : memref<744x64xf32, #tpu.memory_space<vmem>>, vector<128x64xf32>
    %c232 = arith.constant 232 : index
    %c0_30 = arith.constant 0 : index
    %56 = vector.load %arg2[%c232, %c0_30] : memref<744x64xf32, #tpu.memory_space<vmem>>, vector<128x64xf32>
    %cst_31 = arith.constant dense<0.000000e+00> : vector<8x64xf32>
    %57 = tpu.matmul %54, %55, %cst_31 {dimension_numbers = #tpu.dot_dimension_numbers<[1], [0], [0], [1], [0, 0, 1, 1], [], []>} : vector<8x128xf32>, vector<128x64xf32>, vector<8x64xf32> -> vector<8x64xf32>
    %cst_32 = arith.constant dense<0.000000e+00> : vector<8x64xf32>
    %58 = tpu.matmul %54, %56, %cst_32 {dimension_numbers = #tpu.dot_dimension_numbers<[1], [0], [0], [1], [0, 0, 1, 1], [], []>} : vector<8x128xf32>, vector<128x64xf32>, vector<8x64xf32> -> vector<8x64xf32>
    %59 = math.absf %58 : vector<8x64xf32>
    %60 = arith.addf %57, %59 : vector<8x64xf32>
    %cst_33 = arith.constant 5.000000e-01 : f32
    %61 = vector.broadcast %cst_33 : f32 to vector<8x64xf32>
    %62 = arith.mulf %61, %60 : vector<8x64xf32>
    %c0_34 = arith.constant 0 : index
    %c0_35 = arith.constant 0 : index
    %63 = vector.load %arg3[%c0_34, %c0_35] : memref<96x8xf32, #tpu.memory_space<vmem>>, vector<40x8xf32>
    %c40 = arith.constant 40 : index
    %c0_36 = arith.constant 0 : index
    %64 = vector.load %arg3[%c40, %c0_36] : memref<96x8xf32, #tpu.memory_space<vmem>>, vector<40x8xf32>
    %cst_37 = arith.constant dense<0.000000e+00> : vector<40x64xf32>
    %65 = tpu.matmul %63, %62, %cst_37 {dimension_numbers = #tpu.dot_dimension_numbers<[1], [0], [0], [1], [0, 0, 1, 1], [], []>} : vector<40x8xf32>, vector<8x64xf32>, vector<40x64xf32> -> vector<40x64xf32>
    %cst_38 = arith.constant dense<0.000000e+00> : vector<40x64xf32>
    %66 = tpu.matmul %64, %62, %cst_38 {dimension_numbers = #tpu.dot_dimension_numbers<[1], [0], [0], [1], [0, 0, 1, 1], [], []>} : vector<40x8xf32>, vector<8x64xf32>, vector<40x64xf32> -> vector<40x64xf32>
    %67 = math.absf %66 : vector<40x64xf32>
    %68 = arith.addf %65, %67 : vector<40x64xf32>
    %cst_39 = arith.constant 5.000000e-01 : f32
    %69 = vector.broadcast %cst_39 : f32 to vector<40x64xf32>
    %70 = arith.mulf %69, %68 : vector<40x64xf32>
    %c8_40 = arith.constant 8 : index
    %c0_41 = arith.constant 0 : index
    %71 = vector.load %arg1[%c8_40, %c0_41] : memref<736x128xf32, #tpu.memory_space<vmem>>, vector<1x128xf32>
    %72 = vector.extract_strided_slice %70 {offsets = [0, 0], sizes = [8, 64], strides = [1, 1]} : vector<40x64xf32> to vector<8x64xf32>
    %c224 = arith.constant 224 : index
    %c0_42 = arith.constant 0 : index
    %73 = vector.load %arg1[%c224, %c0_42] : memref<736x128xf32, #tpu.memory_space<vmem>>, vector<64x128xf32>
    %cst_43 = arith.constant dense<0.000000e+00> : vector<8x128xf32>
    %74 = tpu.matmul %72, %73, %cst_43 {dimension_numbers = #tpu.dot_dimension_numbers<[1], [0], [0], [1], [0, 0, 1, 1], [], []>} : vector<8x64xf32>, vector<64x128xf32>, vector<8x128xf32> -> vector<8x128xf32>
    %75 = vector.broadcast %71 : vector<1x128xf32> to vector<8x128xf32>
    %76 = arith.addf %75, %74 : vector<8x128xf32>
    %77 = vector.extract_strided_slice %70 {offsets = [8, 0], sizes = [8, 64], strides = [1, 1]} : vector<40x64xf32> to vector<8x64xf32>
    %c288 = arith.constant 288 : index
    %c0_44 = arith.constant 0 : index
    %78 = vector.load %arg1[%c288, %c0_44] : memref<736x128xf32, #tpu.memory_space<vmem>>, vector<64x128xf32>
    %cst_45 = arith.constant dense<0.000000e+00> : vector<8x128xf32>
    %79 = tpu.matmul %77, %78, %cst_45 {dimension_numbers = #tpu.dot_dimension_numbers<[1], [0], [0], [1], [0, 0, 1, 1], [], []>} : vector<8x64xf32>, vector<64x128xf32>, vector<8x128xf32> -> vector<8x128xf32>
    %80 = arith.addf %76, %79 : vector<8x128xf32>
    %81 = vector.extract_strided_slice %70 {offsets = [16, 0], sizes = [8, 64], strides = [1, 1]} : vector<40x64xf32> to vector<8x64xf32>
    %c352 = arith.constant 352 : index
    %c0_46 = arith.constant 0 : index
    %82 = vector.load %arg1[%c352, %c0_46] : memref<736x128xf32, #tpu.memory_space<vmem>>, vector<64x128xf32>
    %cst_47 = arith.constant dense<0.000000e+00> : vector<8x128xf32>
    %83 = tpu.matmul %81, %82, %cst_47 {dimension_numbers = #tpu.dot_dimension_numbers<[1], [0], [0], [1], [0, 0, 1, 1], [], []>} : vector<8x64xf32>, vector<64x128xf32>, vector<8x128xf32> -> vector<8x128xf32>
    %84 = arith.addf %80, %83 : vector<8x128xf32>
    %85 = vector.extract_strided_slice %70 {offsets = [24, 0], sizes = [8, 64], strides = [1, 1]} : vector<40x64xf32> to vector<8x64xf32>
    %c416 = arith.constant 416 : index
    %c0_48 = arith.constant 0 : index
    %86 = vector.load %arg1[%c416, %c0_48] : memref<736x128xf32, #tpu.memory_space<vmem>>, vector<64x128xf32>
    %cst_49 = arith.constant dense<0.000000e+00> : vector<8x128xf32>
    %87 = tpu.matmul %85, %86, %cst_49 {dimension_numbers = #tpu.dot_dimension_numbers<[1], [0], [0], [1], [0, 0, 1, 1], [], []>} : vector<8x64xf32>, vector<64x128xf32>, vector<8x128xf32> -> vector<8x128xf32>
    %88 = arith.addf %84, %87 : vector<8x128xf32>
    %89 = vector.extract_strided_slice %70 {offsets = [32, 0], sizes = [8, 64], strides = [1, 1]} : vector<40x64xf32> to vector<8x64xf32>
    %c480 = arith.constant 480 : index
    %c0_50 = arith.constant 0 : index
    %90 = vector.load %arg1[%c480, %c0_50] : memref<736x128xf32, #tpu.memory_space<vmem>>, vector<64x128xf32>
    %cst_51 = arith.constant dense<0.000000e+00> : vector<8x128xf32>
    %91 = tpu.matmul %89, %90, %cst_51 {dimension_numbers = #tpu.dot_dimension_numbers<[1], [0], [0], [1], [0, 0, 1, 1], [], []>} : vector<8x64xf32>, vector<64x128xf32>, vector<8x128xf32> -> vector<8x128xf32>
    %92 = arith.addf %88, %91 : vector<8x128xf32>
    %cst_52 = arith.constant 0.000000e+00 : f32
    %93 = vector.broadcast %cst_52 : f32 to vector<8x128xf32>
    %94 = arith.maximumf %92, %93 : vector<8x128xf32>
    %c360 = arith.constant 360 : index
    %c0_53 = arith.constant 0 : index
    %95 = vector.load %arg2[%c360, %c0_53] : memref<744x64xf32, #tpu.memory_space<vmem>>, vector<128x64xf32>
    %c488 = arith.constant 488 : index
    %c0_54 = arith.constant 0 : index
    %96 = vector.load %arg2[%c488, %c0_54] : memref<744x64xf32, #tpu.memory_space<vmem>>, vector<128x64xf32>
    %cst_55 = arith.constant dense<0.000000e+00> : vector<8x64xf32>
    %97 = tpu.matmul %94, %95, %cst_55 {dimension_numbers = #tpu.dot_dimension_numbers<[1], [0], [0], [1], [0, 0, 1, 1], [], []>} : vector<8x128xf32>, vector<128x64xf32>, vector<8x64xf32> -> vector<8x64xf32>
    %cst_56 = arith.constant dense<0.000000e+00> : vector<8x64xf32>
    %98 = tpu.matmul %94, %96, %cst_56 {dimension_numbers = #tpu.dot_dimension_numbers<[1], [0], [0], [1], [0, 0, 1, 1], [], []>} : vector<8x128xf32>, vector<128x64xf32>, vector<8x64xf32> -> vector<8x64xf32>
    %99 = math.absf %98 : vector<8x64xf32>
    %100 = arith.addf %97, %99 : vector<8x64xf32>
    %cst_57 = arith.constant 5.000000e-01 : f32
    %101 = vector.broadcast %cst_57 : f32 to vector<8x64xf32>
    %102 = arith.mulf %101, %100 : vector<8x64xf32>
    %c16 = arith.constant 16 : index
    %c0_58 = arith.constant 0 : index
    %103 = vector.load %arg1[%c16, %c0_58] : memref<736x128xf32, #tpu.memory_space<vmem>>, vector<1x128xf32>
    %c80_59 = arith.constant 80 : index
    %c0_60 = arith.constant 0 : index
    %104 = vector.load %arg3[%c80_59, %c0_60] : memref<96x8xf32, #tpu.memory_space<vmem>>, vector<1x8xf32>
    %c88 = arith.constant 88 : index
    %c0_61 = arith.constant 0 : index
    %105 = vector.load %arg3[%c88, %c0_61] : memref<96x8xf32, #tpu.memory_space<vmem>>, vector<1x8xf32>
    %cst_62 = arith.constant dense<0.000000e+00> : vector<1x64xf32>
    %106 = tpu.matmul %104, %102, %cst_62 {dimension_numbers = #tpu.dot_dimension_numbers<[1], [0], [0], [1], [0, 0, 1, 1], [], []>} : vector<1x8xf32>, vector<8x64xf32>, vector<1x64xf32> -> vector<1x64xf32>
    %cst_63 = arith.constant dense<0.000000e+00> : vector<1x64xf32>
    %107 = tpu.matmul %105, %102, %cst_63 {dimension_numbers = #tpu.dot_dimension_numbers<[1], [0], [0], [1], [0, 0, 1, 1], [], []>} : vector<1x8xf32>, vector<8x64xf32>, vector<1x64xf32> -> vector<1x64xf32>
    %108 = math.absf %107 : vector<1x64xf32>
    %109 = arith.addf %106, %108 : vector<1x64xf32>
    %cst_64 = arith.constant 5.000000e-01 : f32
    %110 = vector.broadcast %cst_64 : f32 to vector<1x64xf32>
    %111 = arith.mulf %110, %109 : vector<1x64xf32>
    %c544 = arith.constant 544 : index
    %c0_65 = arith.constant 0 : index
    %112 = vector.load %arg1[%c544, %c0_65] : memref<736x128xf32, #tpu.memory_space<vmem>>, vector<64x128xf32>
    %cst_66 = arith.constant dense<0.000000e+00> : vector<1x128xf32>
    %113 = tpu.matmul %111, %112, %cst_66 {dimension_numbers = #tpu.dot_dimension_numbers<[1], [0], [0], [1], [0, 0, 1, 1], [], []>} : vector<1x64xf32>, vector<64x128xf32>, vector<1x128xf32> -> vector<1x128xf32>
    %114 = arith.addf %103, %113 : vector<1x128xf32>
    %c81 = arith.constant 81 : index
    %c0_67 = arith.constant 0 : index
    %115 = vector.load %arg3[%c81, %c0_67] : memref<96x8xf32, #tpu.memory_space<vmem>>, vector<1x8xf32>
    %c89 = arith.constant 89 : index
    %c0_68 = arith.constant 0 : index
    %116 = vector.load %arg3[%c89, %c0_68] : memref<96x8xf32, #tpu.memory_space<vmem>>, vector<1x8xf32>
    %cst_69 = arith.constant dense<0.000000e+00> : vector<1x64xf32>
    %117 = tpu.matmul %115, %102, %cst_69 {dimension_numbers = #tpu.dot_dimension_numbers<[1], [0], [0], [1], [0, 0, 1, 1], [], []>} : vector<1x8xf32>, vector<8x64xf32>, vector<1x64xf32> -> vector<1x64xf32>
    %cst_70 = arith.constant dense<0.000000e+00> : vector<1x64xf32>
    %118 = tpu.matmul %116, %102, %cst_70 {dimension_numbers = #tpu.dot_dimension_numbers<[1], [0], [0], [1], [0, 0, 1, 1], [], []>} : vector<1x8xf32>, vector<8x64xf32>, vector<1x64xf32> -> vector<1x64xf32>
    %119 = math.absf %118 : vector<1x64xf32>
    %120 = arith.addf %117, %119 : vector<1x64xf32>
    %cst_71 = arith.constant 5.000000e-01 : f32
    %121 = vector.broadcast %cst_71 : f32 to vector<1x64xf32>
    %122 = arith.mulf %121, %120 : vector<1x64xf32>
    %c608 = arith.constant 608 : index
    %c0_72 = arith.constant 0 : index
    %123 = vector.load %arg1[%c608, %c0_72] : memref<736x128xf32, #tpu.memory_space<vmem>>, vector<64x128xf32>
    %cst_73 = arith.constant dense<0.000000e+00> : vector<1x128xf32>
    %124 = tpu.matmul %122, %123, %cst_73 {dimension_numbers = #tpu.dot_dimension_numbers<[1], [0], [0], [1], [0, 0, 1, 1], [], []>} : vector<1x64xf32>, vector<64x128xf32>, vector<1x128xf32> -> vector<1x128xf32>
    %125 = arith.addf %114, %124 : vector<1x128xf32>
    %cst_74 = arith.constant 0.000000e+00 : f32
    %126 = vector.broadcast %cst_74 : f32 to vector<1x128xf32>
    %127 = arith.maximumf %125, %126 : vector<1x128xf32>
    %c616 = arith.constant 616 : index
    %c0_75 = arith.constant 0 : index
    %128 = vector.load %arg2[%c616, %c0_75] : memref<744x64xf32, #tpu.memory_space<vmem>>, vector<128x64xf32>
    %c0_76 = arith.constant 0 : index
    %c0_77 = arith.constant 0 : index
    %129 = vector.load %arg2[%c0_76, %c0_77] : memref<744x64xf32, #tpu.memory_space<vmem>>, vector<1x64xf32>
    %cst_78 = arith.constant dense<0.000000e+00> : vector<1x64xf32>
    %130 = tpu.matmul %127, %128, %cst_78 {dimension_numbers = #tpu.dot_dimension_numbers<[1], [0], [0], [1], [0, 0, 1, 1], [], []>} : vector<1x128xf32>, vector<128x64xf32>, vector<1x64xf32> -> vector<1x64xf32>
    %131 = arith.addf %130, %129 : vector<1x64xf32>
    %cst_79 = arith.constant 0.000000e+00 : f32
    %132 = vector.broadcast %cst_79 : f32 to vector<1x64xf32>
    %133 = arith.maximumf %131, %132 : vector<1x64xf32>
    %c672 = arith.constant 672 : index
    %c0_80 = arith.constant 0 : index
    %134 = vector.load %arg1[%c672, %c0_80] : memref<736x128xf32, #tpu.memory_space<vmem>>, vector<64x128xf32>
    %c24 = arith.constant 24 : index
    %c0_81 = arith.constant 0 : index
    %135 = vector.load %arg1[%c24, %c0_81] : memref<736x128xf32, #tpu.memory_space<vmem>>, vector<1x128xf32>
    %cst_82 = arith.constant dense<0.000000e+00> : vector<1x128xf32>
    %136 = tpu.matmul %133, %134, %cst_82 {dimension_numbers = #tpu.dot_dimension_numbers<[1], [0], [0], [1], [0, 0, 1, 1], [], []>} : vector<1x64xf32>, vector<64x128xf32>, vector<1x128xf32> -> vector<1x128xf32>
    %137 = arith.addf %136, %135 : vector<1x128xf32>
    %c0_83 = arith.constant 0 : index
    %c0_84 = arith.constant 0 : index
    %138 = vector.load %arg4[%c0_83, %c0_84] : memref<1x128xf32, #tpu.memory_space<vmem>>, vector<1x128xf32>
    tpu.vector_store %arg4[%c0_83, %c0_84], %137 {strides = array<i32>} : memref<1x128xf32, #tpu.memory_space<vmem>>, vector<1x128xf32>,
    return
  }
}

</mosaic_0001>

<bundles_post_ra>
// kernel: forward.1
= control target key start
LH: loop header
LB: loop body
LE: loop exit
PB: predicated region body
PF: predicated region fallthrough
CT: control target
= control target key end

     0   :  { %vm38_vm0 = vcmask 523264   ;;  %v3876_v5 = vmov 0.0|0.0   ;;  %s4755_s0 = inlined_call_operand.vmem [shape: f32[64,16], index: 0, kind: input, shape index: {}]   ;;  %s4756_s1 = inlined_call_operand.vmem [shape: f32[736,128], index: 1, kind: input, shape index: {}]   ;;  %s4757_s2 = inlined_call_operand.vmem [shape: f32[744,64], index: 2, kind: input, shape index: {}]   ;;  %s4758_s3 = inlined_call_operand.vmem [shape: f32[96,8], index: 3, kind: input, shape index: {}]   ;;  %s4759_s4 = inlined_call_operand.hbm [shape: f32[1,128], index: 4, kind: output, shape index: {}]  }
   0x1   :  { %v18_v0 = vld [vmem:[%s4755_s0] sm:$0xff]  ;;  %v19_v1 = vld [vmem:[%s4755_s0 + $0x8] sm:$0xff]  ;;  %v20_v2 = vld [vmem:[%s4755_s0 + $0x10] sm:$0xff]  ;;  %3561 = vmatprep.subr.bf16.mxu1 %v3876_v5 }
   0x2   :  { %v3545_v3 = vpack.c.bf16 %v19_v1, %v18_v0  ;;  %v21_v4 = vld [vmem:[%s4755_s0 + $0x18] sm:$0xff]  ;;  %v22_v7 = vld [vmem:[%s4755_s0 + $0x20] sm:$0xff]  ;;  %v23_v8 = vld [vmem:[%s4755_s0 + $0x28] sm:$0xff] }
   0x3   :  { %v3549_v6 = vpack.c.bf16 %v21_v4, %v20_v2  ;;  %v26_v9 = vld [vmem:[%s4757_s2 + $0x8] sm:$0xff]  ;;  %v3553_v10 = vpack.c.bf16 %v23_v8, %v22_v7  ;;  %v24_v11 = vld [vmem:[%s4755_s0 + $0x30] sm:$0xff]  ;;  %v25_v12 = vld [vmem:[%s4755_s0 + $0x38] sm:$0xff] }
   0x4   :  { %3546 = vmatprep.subr.bf16.mxu0 %v3545_v3  ;;  %3062 = vmatprep.mubr.msk.f32.mxu0 %vm38_vm0, %v26_v9  ;;  %v201_v13 = vld [vmem:[%s4756_s1 + $0x20] sm:$0xff]  ;;  %v202_v14 = vld [vmem:[%s4756_s1 + $0x28] sm:$0xff] }
   0x5   :  { %3548 = vmatpush3.bf16.msra.mxu0 %v3545_v3 }
   0x6   :  { %3550 = vmatprep.subr.bf16.mxu0 %v3549_v6 }
   0x7   :  { %9 = vsyncpa [#allocation3], 0  ;;  %v3562_v15 = vpack.c.bf16 %v202_v14, %v201_v13  ;;  %v3557_v16 = vpack.c.bf16 %v25_v12, %v24_v11  ;;  %v27_v17 = vld [vmem:[%s4757_s2 + $0x10] sm:$0xff]  ;;  %v28_v18 = vld [vmem:[%s4757_s2 + $0x18] sm:$0xff]  ;;  %vm3877_vm1 = vmmov 0   ;;  %v3878_v28 = vmov 0.0  }
   0x8   :  { %v29_v19 = vld [vmem:[%s4757_s2 + $0x20] sm:$0xff]  ;;  %v30_v20 = vld [vmem:[%s4757_s2 + $0x28] sm:$0xff]  ;;  %v31_v21 = vld [vmem:[%s4757_s2 + $0x30] sm:$0xff]  ;;  %3084 = vmatprep.mubr.msk.f32.mxu1 %vm3877_vm1, %v3878_v28  ;;  %vm203_vm2 = vcmask 130048   ;;  %vm1303_vm3 = vcmask 64512   ;;  %s3879_s21 = smov [#allocation2]  }
   0x9   :  { %3552 = vmatpush3.bf16.msra.mxu0 %v3549_v6  ;;  %3563 = vmatpush3.bf16.msra.mxu1 %v3562_v15  ;;  %v32_v22 = vld [vmem:[%s4757_s2 + $0x38] sm:$0xff]  ;;  %v33_v23 = vld [vmem:[%s4757_s2 + $0x40] sm:$0xff]  ;;  %v34_v24 = vld [vmem:[%s4757_s2 + $0x48] sm:$0xff]  ;;  %s2757_s22 = sshll.u32 %s3879_s21, 4  ;;  %s2758_s22 = int_to_ptr.vmem [resolvable:$true] %s2757_s22 }
   0xa   :  { %3554 = vmatprep.subr.bf16.mxu0 %v3553_v10  ;;  %3564 = vmatprep.subr.bf16.mxu1 %v3876_v5  ;;  %v35_v25 = vld [vmem:[%s4757_s2 + $0x50] sm:$0xff]  ;;  %v36_v26 = vld [vmem:[%s4757_s2 + $0x58] sm:$0xff]  ;;  %v37_v27 = vld [vmem:[%s4757_s2 + $0x60] sm:$0xff]  ;;  %s3852_s23 = scalar_lea.vmem %s2758_s22, 16  ;;  %p3857_p1 = scmp.lt.s32.totalorder %s2758_s22, %s2758_s22 }
   0xb   :  { %v1135_v29 = vld [vmem:[%s4757_s2 + $0xe8] sm:$0xff]  ;;  %v1136_v30 = vld [vmem:[%s4757_s2 + $0xf0] sm:$0xff]  ;;  %v1137_v31 = vld [vmem:[%s4757_s2 + $0xf8] sm:$0xff]  ;;  %p3853_p0 = scmp.ne.s32.totalorder %s2758_s22, %s3852_s23 }
   0xc   :  { %v3598_v32 = vpack.c.bf16 %v1136_v30, %v1135_v29  ;;  %v1138_v33 = vld [vmem:[%s4757_s2 + $0x100] sm:$0xff]  ;;  %v1139_v35 = vld [vmem:[%s4757_s2 + $0x108] sm:$0xff]  ;;  %v1140_v36 = vld [vmem:[%s4757_s2 + $0x110] sm:$0xff] }
   0xd   :  { %3556 = vmatpush3.bf16.msra.mxu0 %v3553_v10  ;;  %v3601_v34 = vpack.c.bf16 %v1138_v33, %v1137_v31  ;;  %v3604_v37 = vpack.c.bf16 %v1140_v36, %v1139_v35  ;;  %v1141_v38 = vld [vmem:[%s4757_s2 + $0x118] sm:$0xff]  ;;  %v1142_v39 = vld [vmem:[%s4757_s2 + $0x120] sm:$0xff]  ;;  %v1143_v41 = vld [vmem:[%s4757_s2 + $0x128] sm:$0xff] }
   0xe   :  { %3558 = vmatprep.subr.bf16.mxu0 %v3557_v16  ;;  %v3607_v40 = vpack.c.bf16 %v1142_v39, %v1141_v38  ;;  %v1144_v42 = vld [vmem:[%s4757_s2 + $0x130] sm:$0xff]  ;;  %v1145_v44 = vld [vmem:[%s4757_s2 + $0x138] sm:$0xff]  ;;  %v1146_v45 = vld [vmem:[%s4757_s2 + $0x140] sm:$0xff] }
   0xf   :  { %v3610_v43 = vpack.c.bf16 %v1144_v42, %v1143_v41  ;;  %v3613_v46 = vpack.c.bf16 %v1146_v45, %v1145_v44  ;;  %v1147_v47 = vld [vmem:[%s4757_s2 + $0x148] sm:$0xff]  ;;  %v1148_v48 = vld [vmem:[%s4757_s2 + $0x150] sm:$0xff]  ;;  %v283_v51 = vld [vmem:[%s4756_s1 + $0x38] sm:$0xff] }
  0x10   :  { %v3616_v49 = vpack.c.bf16 %v1148_v48, %v1147_v47  ;;  %v282_v50 = vld [vmem:[%s4756_s1 + $0x30] sm:$0xff]  ;;  %v358_v55 = vld [vmem:[%s4756_s1 + $0x40] sm:$0xff]  ;;  %v359_v56 = vld [vmem:[%s4756_s1 + $0x48] sm:$0xff] }
  0x11   :  { %3560 = vmatpush3.bf16.msra.mxu0 %v3557_v16  ;;  %v3565_v52 = vpack.c.bf16 %v283_v51, %v282_v50  ;;  %v3568_v59 = vpack.c.bf16 %v359_v56, %v358_v55  ;;  %v434_v62 = vld [vmem:[%s4756_s1 + $0x50] sm:$0xff]  ;;  %v435_v63 = vld [vmem:[%s4756_s1 + $0x58] sm:$0xff]  ;;  %v510_v6 = vld [vmem:[%s4756_s1 + $0x60] sm:$0xff] }
  0x12   :  { %3597 = vmatprep.subr.bf16.mxu0 %v3876_v5  ;;  %v3571_v2 = vpack.c.bf16 %v435_v63, %v434_v62  ;;  %v511_v7 = vld [vmem:[%s4756_s1 + $0x68] sm:$0xff]  ;;  %v586_v11 = vld [vmem:[%s4756_s1 + $0x70] sm:$0xff]  ;;  %v587_v12 = vld [vmem:[%s4756_s1 + $0x78] sm:$0xff] }
  0x13   :  { %v3574_v10 = vpack.c.bf16 %v511_v7, %v510_v6  ;;  %v3577_v13 = vpack.c.bf16 %v587_v12, %v586_v11  ;;  %v662_v14 = vld [vmem:[%s4756_s1 + $0x80] sm:$0xff]  ;;  %v663_v15 = vld [vmem:[%s4756_s1 + $0x88] sm:$0xff]  ;;  %v1042_v30 = vld [vmem:[%s4756_s1 + $0xd0] sm:$0xff] }
  0x14   :  { %3063 = vmatmul.mubr.msk.f32.vlgmr.msra.gmra.mrb[0].mxu0 %vm38_vm0, %v27_v17  ;;  %v3580_v16 = vpack.c.bf16 %v663_v15, %v662_v14  ;;  %v738_v17 = vld [vmem:[%s4756_s1 + $0x90] sm:$0xff]  ;;  %v1043_v31 = vld [vmem:[%s4756_s1 + $0xd8] sm:$0xff]  ;;  %v2778_v36 = vld [vmem:[%s4756_s1] ss:$0 sm:$0xff] }
  0x15   :  { %3065 = vmatprep.mubr.msk.f32.mxu0 %vm38_vm0, %v28_v18  ;;  %3599 = vmatpush3.bf16.msra.mxu0 %v3598_v32  ;;  %v739_v18 = vld [vmem:[%s4756_s1 + $0x98] sm:$0xff]  ;;  %v3595_v32 = vpack.c.bf16 %v1043_v31, %v1042_v30  ;;  %v1120_v38 = vld [vmem:[%s4757_s2 + $0x70] sm:$0xff]  ;;  %v1122_v45 = vld [vmem:[%s4757_s2 + $0x80] sm:$0xff] }
  0x16   :  { %3600 = vmatprep.subr.bf16.mxu0 %v3876_v5  ;;  %v1149_v33 = vld [vmem:[%s4757_s2 + $0x158] sm:$0xff]  ;;  %v1123_v47 = vld [vmem:[%s4757_s2 + $0x88] sm:$0xff]  ;;  %v1124_v48 = vld [vmem:[%s4757_s2 + $0x90] sm:$0xff] }
  0x17   :  { %v1121_v44 = vld [vmem:[%s4757_s2 + $0x78] sm:$0xff]  ;;  %v1126_v51 = vld [vmem:[%s4757_s2 + $0xa0] sm:$0xff]  ;;  %v1294_v15 = vld [vmem:[%s4758_s3 + $0x8] sm:$0xff] }
  0x18   :  { %3066 = vmatmul.mubr.msk.f32.gmra.mrb[2].mxu0 %vm38_vm0, %v29_v19  ;;  %v3583_v19 = vpack.c.bf16 %v739_v18, %v738_v17  ;;  %v1125_v50 = vld [vmem:[%s4757_s2 + $0x98] sm:$0xff]  ;;  %v1134_v63 = vld [vmem:[%s4757_s2 + $0xe0] sm:$0xff] }
  0x19   :  { %3068 = vmatprep.mubr.msk.f32.mxu0 %vm38_vm0, %v30_v20  ;;  %3602 = vmatpush3.bf16.msra.mxu0 %v3601_v34  ;;  %v814_v20 = vld [vmem:[%s4756_s1 + $0xa0] sm:$0xff]  ;;  %v1129_v56 = vld [vmem:[%s4757_s2 + $0xb8] sm:$0xff] }
  0x1a   :  { %3603 = vmatprep.subr.bf16.mxu0 %v3876_v5  ;;  %v1150_v34 = vld [vmem:[%s4757_s2 + $0x160] sm:$0xff]  ;;  %v1133_v62 = vld [vmem:[%s4757_s2 + $0xd8] sm:$0xff] }
  0x1b   :  { %v3619_v35 = vpack.c.bf16 %v1150_v34, %v1149_v33  ;;  %v1300_v11 = vld [vmem:[%s4758_s3 + $0x38] sm:$0xff]  ;;  %v1301_v12 = vld [vmem:[%s4758_s3 + $0x40] sm:$0xff]  ;;  %v1957_v33 = vld [vmem:[%s4757_s2 + $0x1f0] sm:$0xff] }
  0x1c   :  { %3069 = vmatmul.mubr.msk.f32.gmra.mrb[4].mxu0 %vm38_vm0, %v31_v21  ;;  %v815_v21 = vld [vmem:[%s4756_s1 + $0xa8] sm:$0xff]  ;;  %v1293_v14 = vld [vmem:[%s4758_s3] sm:$0xff]  ;;  %v1296_v17 = vld [vmem:[%s4758_s3 + $0x18] sm:$0xff] }
  0x1d   :  { %3071 = vmatprep.mubr.msk.f32.mxu0 %vm38_vm0, %v32_v22  ;;  %3605 = vmatpush3.bf16.msra.mxu0 %v3604_v37  ;;  %v3586_v22 = vpack.c.bf16 %v815_v21, %v814_v20  ;;  %v1119_v37 = vld [vmem:[%s4757_s2 + $0x68] sm:$0xff]  ;;  %v1297_v18 = vld [vmem:[%s4758_s3 + $0x20] sm:$0xff]  ;;  %v1532_v30 = vld [vmem:[%s4756_s1 + $0x118] sm:$0xff] }
  0x1e   :  { %3606 = vmatprep.subr.bf16.mxu0 %v3876_v5  ;;  %v3622_v42 = vpack.c.bf16 %v1120_v38, %v1119_v37  ;;  %v1526_v20 = vld [vmem:[%s4756_s1 + $0xe8] sm:$0xff]  ;;  %v1958_v34 = vld [vmem:[%s4757_s2 + $0x1f8] sm:$0xff] }
  0x1f   :  { %v1960_v38 = vld [vmem:[%s4757_s2 + $0x208] sm:$0xff] }
  0x20   :  { %3072 = vmatmul.mubr.msk.f32.gmra.mrb[6].mxu0 %vm38_vm0, %v33_v23  ;;  %v890_v23 = vld [vmem:[%s4756_s1 + $0xb0] sm:$0xff] }
  0x21   :  { %3074 = vmatprep.mubr.msk.f32.mxu0 %vm38_vm0, %v34_v24  ;;  %3608 = vmatpush3.bf16.msra.mxu0 %v3607_v40  ;;  %v891_v24 = vld [vmem:[%s4756_s1 + $0xb8] sm:$0xff] }
  0x22   :  { %3609 = vmatprep.subr.bf16.mxu0 %v3876_v5 }
  0x24   :  { %3075 = vmatmul.mubr.msk.f32.gmra.mrb[8].mxu0 %vm38_vm0, %v35_v25  ;;  %v3589_v25 = vpack.c.bf16 %v891_v24, %v890_v23  ;;  %v1528_v23 = vld [vmem:[%s4756_s1 + $0xf8] sm:$0xff] }
  0x25   :  { %3077 = vmatprep.mubr.msk.f32.mxu0 %vm38_vm0, %v36_v26  ;;  %3611 = vmatpush3.bf16.msra.mxu0 %v3610_v43  ;;  %v966_v26 = vld [vmem:[%s4756_s1 + $0xc0] sm:$0xff] }
  0x26   :  { %3612 = vmatprep.subr.bf16.mxu0 %v3876_v5 }
  0x28   :  { %3078 = vmatmul.mubr.msk.f32.gmra.mrb[10].mxu0 %vm38_vm0, %v37_v27  ;;  %v967_v27 = vld [vmem:[%s4756_s1 + $0xc8] sm:$0xff] }
  0x29   :  { %3196 = vmatprep.mubr.msk.f32.mxu0 %vm3877_vm1, %v3878_v28  ;;  %3614 = vmatpush3.bf16.msra.mxu0 %v3613_v46  ;;  %v3592_v29 = vpack.c.bf16 %v967_v27, %v966_v26  ;;  %v3625_v46 = vpack.c.bf16 %v1122_v45, %v1121_v44  ;;  %v1530_v26 = vld [vmem:[%s4756_s1 + $0x108] sm:$0xff]  ;;  %v1965_v45 = vld [vmem:[%s4757_s2 + $0x230] sm:$0xff] }
  0x2a   :  { %3615 = vmatprep.subr.bf16.mxu0 %v3876_v5  ;;  %v1964_v44 = vld [vmem:[%s4757_s2 + $0x228] sm:$0xff] }
  0x2d   :  { %3617 = vmatpush3.bf16.msra.mxu0 %v3616_v49  ;;  %v3628_v49 = vpack.c.bf16 %v1124_v48, %v1123_v47  ;;  %v1966_v47 = vld [vmem:[%s4757_s2 + $0x238] sm:$0xff]  ;;  %v1967_v48 = vld [vmem:[%s4757_s2 + $0x240] sm:$0xff] }
  0x2e   :  { %3618 = vmatprep.subr.bf16.mxu0 %v3876_v5 }
  0x31   :  { %3620 = vmatpush3.bf16.msra.mxu0 %v3619_v35 }
  0x32   :  { %3621 = vmatprep.subr.bf16.mxu0 %v3876_v5 }
  0xe7   :  { %v3064_v53 = vpop.f32.mrb[0].mxu0 }
  0xe8   :  { %v141_v54 = vpop.f32.mrb[1].mxu0 }
  0xe9   :  { %3085 = vmatmul.mubr.msk.f32.vlgmr.msra.gmra.mrb[0].mxu1 %vm203_vm2, %v141_v54  ;;  %v1128_v54 = vld [vmem:[%s4757_s2 + $0xb0] sm:$0xff] }
  0xea   :  { %3566 = vmatpush3.bf16.msra.mxu1 %v3565_v52  ;;  %3091 = vmatprep.mubr.msk.f32.mxu1 %vm3877_vm1, %v3878_v28  ;;  %v3631_v52 = vpack.c.bf16 %v1126_v51, %v1125_v50  ;;  %v1968_v50 = vld [vmem:[%s4757_s2 + $0x248] sm:$0xff]  ;;  %v1969_v51 = vld [vmem:[%s4757_s2 + $0x250] sm:$0xff] }
  0xeb   :  { %3567 = vmatprep.subr.bf16.mxu1 %v3876_v5  ;;  %v3067_v57 = vpop.f32.mrb[2].mxu0 }
  0xec   :  { %v151_v58 = vpop.f32.mrb[3].mxu0 }
  0xef   :  { %v3070_v60 = vpop.f32.mrb[4].mxu0 }
  0xf0   :  { %v161_v61 = vpop.f32.mrb[5].mxu0 }
  0xf1   :  { %3092 = vmatmul.mubr.msk.f32.vlgmr.msra.gmra.mrb[0].mxu1 %vm203_vm2, %v3064_v53  ;;  %v1127_v53 = vld [vmem:[%s4757_s2 + $0xa8] sm:$0xff] }
  0xf2   :  { %3569 = vmatpush3.bf16.msra.mxu1 %v3568_v59  ;;  %3098 = vmatprep.mubr.msk.f32.mxu1 %vm3877_vm1, %v3878_v28  ;;  %v3634_v55 = vpack.c.bf16 %v1128_v54, %v1127_v53  ;;  %v1131_v59 = vld [vmem:[%s4757_s2 + $0xc8] sm:$0xff] }
  0xf3   :  { %3570 = vmatprep.subr.bf16.mxu1 %v3876_v5  ;;  %v3073_v0 = vpop.f32.mrb[6].mxu0 }
  0xf4   :  { %v171_v1 = vpop.f32.mrb[7].mxu0 }
  0xf7   :  { %v3076_v3 = vpop.f32.mrb[8].mxu0 }
  0xf8   :  { %v181_v4 = vpop.f32.mrb[9].mxu0 }
  0xf9   :  { %3099 = vmatmul.mubr.msk.f32.vlgmr.msra.gmra.mrb[0].mxu1 %vm203_vm2, %v151_v58 }
  0xfa   :  { %3572 = vmatpush3.bf16.msra.mxu1 %v3571_v2  ;;  %3105 = vmatprep.mubr.msk.f32.mxu1 %vm3877_vm1, %v3878_v28 }
  0xfb   :  { %3573 = vmatprep.subr.bf16.mxu1 %v3876_v5  ;;  %v3079_v8 = vpop.f32.mrb[10].mxu0 }
  0xfc   :  { %v191_v9 = vpop.f32.mrb[11].mxu0 }
 0x101   :  { %3106 = vmatmul.mubr.msk.f32.vlgmr.msra.gmra.mrb[0].mxu1 %vm203_vm2, %v3067_v57  ;;  %v1130_v57 = vld [vmem:[%s4757_s2 + $0xc0] sm:$0xff] }
 0x102   :  { %3575 = vmatpush3.bf16.msra.mxu1 %v3574_v10  ;;  %3112 = vmatprep.mubr.msk.f32.mxu1 %vm3877_vm1, %v3878_v28  ;;  %v3637_v58 = vpack.c.bf16 %v1130_v57, %v1129_v56  ;;  %v1299_v10 = vld [vmem:[%s4758_s3 + $0x30] sm:$0xff] }
 0x103   :  { %3576 = vmatprep.subr.bf16.mxu1 %v3876_v5 }
 0x109   :  { %3113 = vmatmul.mubr.msk.f32.vlgmr.msra.gmra.mrb[0].mxu1 %vm203_vm2, %v161_v61 }
 0x10a   :  { %3578 = vmatpush3.bf16.msra.mxu1 %v3577_v13  ;;  %3119 = vmatprep.mubr.msk.f32.mxu1 %vm3877_vm1, %v3878_v28  ;;  %v1302_v13 = vld [vmem:[%s4758_s3 + $0x48] sm:$0xff] }
 0x10b   :  { %3579 = vmatprep.subr.bf16.mxu1 %v3876_v5 }
 0x111   :  { %3120 = vmatmul.mubr.msk.f32.vlgmr.msra.gmra.mrb[0].mxu1 %vm203_vm2, %v3070_v60  ;;  %v1132_v60 = vld [vmem:[%s4757_s2 + $0xd0] sm:$0xff] }
 0x112   :  { %3581 = vmatpush3.bf16.msra.mxu1 %v3580_v16  ;;  %3126 = vmatprep.mubr.msk.f32.mxu1 %vm3877_vm1, %v3878_v28  ;;  %v3640_v61 = vpack.c.bf16 %v1132_v60, %v1131_v59  ;;  %v1295_v16 = vld [vmem:[%s4758_s3 + $0x10] sm:$0xff] }
 0x113   :  { %3582 = vmatprep.subr.bf16.mxu1 %v3876_v5 }
 0x119   :  { %3127 = vmatmul.mubr.msk.f32.vlgmr.msra.gmra.mrb[0].mxu1 %vm203_vm2, %v171_v1 }
 0x11a   :  { %3584 = vmatpush3.bf16.msra.mxu1 %v3583_v19  ;;  %3133 = vmatprep.mubr.msk.f32.mxu1 %vm3877_vm1, %v3878_v28  ;;  %v1525_v19 = vld [vmem:[%s4756_s1 + $0xe0] sm:$0xff] }
 0x11b   :  { %3585 = vmatprep.subr.bf16.mxu1 %v3876_v5  ;;  %v3646_v21 = vpack.c.bf16 %v1526_v20, %v1525_v19 }
 0x121   :  { %3134 = vmatmul.mubr.msk.f32.vlgmr.msra.gmra.mrb[0].mxu1 %vm203_vm2, %v3073_v0  ;;  %v3643_v0 = vpack.c.bf16 %v1134_v63, %v1133_v62 }
 0x122   :  { %3587 = vmatpush3.bf16.msra.mxu1 %v3586_v22  ;;  %3140 = vmatprep.mubr.msk.f32.mxu1 %vm3877_vm1, %v3878_v28  ;;  %v1527_v22 = vld [vmem:[%s4756_s1 + $0xf0] sm:$0xff] }
 0x123   :  { %3588 = vmatprep.subr.bf16.mxu1 %v3876_v5  ;;  %v3649_v24 = vpack.c.bf16 %v1528_v23, %v1527_v22  ;;  %v1617_v23 = vld [vmem:[%s4756_s1 + $0x150] sm:$0xff] }
 0x129   :  { %3141 = vmatmul.mubr.msk.f32.vlgmr.msra.gmra.mrb[0].mxu1 %vm203_vm2, %v181_v4 }
 0x12a   :  { %3590 = vmatpush3.bf16.msra.mxu1 %v3589_v25  ;;  %3147 = vmatprep.mubr.msk.f32.mxu1 %vm3877_vm1, %v3878_v28  ;;  %v1529_v25 = vld [vmem:[%s4756_s1 + $0x100] sm:$0xff] }
 0x12b   :  { %3591 = vmatprep.subr.bf16.mxu1 %v3876_v5  ;;  %v3652_v27 = vpack.c.bf16 %v1530_v26, %v1529_v25 }
 0x131   :  { %3148 = vmatmul.mubr.msk.f32.vlgmr.msra.gmra.mrb[0].mxu1 %vm203_vm2, %v3076_v3 }
 0x132   :  { %3593 = vmatpush3.bf16.msra.mxu1 %v3592_v29  ;;  %3154 = vmatprep.mubr.msk.f32.mxu1 %vm3877_vm1, %v3878_v28  ;;  %v1531_v29 = vld [vmem:[%s4756_s1 + $0x110] sm:$0xff] }
 0x133   :  { %3594 = vmatprep.subr.bf16.mxu1 %v3876_v5  ;;  %v3655_v31 = vpack.c.bf16 %v1532_v30, %v1531_v29 }
 0x139   :  { %3155 = vmatmul.mubr.msk.f32.vlgmr.msra.gmra.mrb[0].mxu1 %vm203_vm2, %v191_v9  ;;  %v1298_v9 = vld [vmem:[%s4758_s3 + $0x28] sm:$0xff] }
 0x13a   :  { %3596 = vmatpush3.bf16.msra.mxu1 %v3595_v32  ;;  %3161 = vmatprep.mubr.msk.f32.mxu1 %vm3877_vm1, %v3878_v28  ;;  %v1956_v32 = vld [vmem:[%s4757_s2 + $0x1e8] sm:$0xff] }
 0x13b   :  { %3234 = vmatprep.subr.mxu1 %v3878_v28  ;;  %v3706_v35 = vpack.c.bf16 %v1957_v33, %v1956_v32  ;;  %v1694_v32 = vld [vmem:[%s4756_s1 + $0x168] sm:$0xff] }
 0x141   :  { %3162 = vmatmul.mubr.msk.f32.vlgmr.msra.gmra.mrb[0].mxu1 %vm203_vm2, %v3079_v8 }
 0x142   :  { %3236 = vmatprep.mubr.msk.f32.mxu1 %vm3877_vm1, %v3878_v28 }
 0x214   :  { %v1113_v39 = vpop.f32.mrb[0].mxu1 }
 0x215   :  { %v3813_v40 = vadd.f32 %v2778_v36, %v1113_v39  ;;  %v3163_v41 = vpop.f32.mrb[1].mxu1  ;;  %v1959_v36 = vld [vmem:[%s4757_s2 + $0x200] sm:$0xff]  ;;  %v1961_v39 = vld [vmem:[%s4757_s2 + $0x210] sm:$0xff] }
 0x216   :  { %v3709_v37 = vpack.c.bf16 %v1959_v36, %v1958_v34  ;;  %v1962_v41 = vld [vmem:[%s4757_s2 + $0x218] sm:$0xff] }
 0x217   :  { %v1118_v43 = vmax.f32 %v3813_v40, 0.0  ;;  %v3712_v40 = vpack.c.bf16 %v1961_v39, %v1960_v38  ;;  %v1695_v38 = vld [vmem:[%s4756_s1 + $0x170] sm:$0xff]  ;;  %v1696_v39 = vld [vmem:[%s4756_s1 + $0x178] sm:$0xff] }
 0x219   :  { %3197 = vmatmul.mubr.f32.vlgmr.msra.gmra.mrb[12].mxu0 %v1118_v43 }
 0x21a   :  { %3623 = vmatpush3.bf16.msra.mxu0 %v3622_v42  ;;  %3231 = vmatprep.mubr.msk.f32.mxu0 %vm3877_vm1, %v3878_v28  ;;  %v1963_v42 = vld [vmem:[%s4757_s2 + $0x220] sm:$0xff] }
 0x21b   :  { %3624 = vmatprep.subr.bf16.mxu0 %v3876_v5 }
 0x21e   :  { %3626 = vmatpush3.bf16.msra.mxu0 %v3625_v46  ;;  %v3718_v46 = vpack.c.bf16 %v1965_v45, %v1964_v44  ;;  %v1699_v44 = vld [vmem:[%s4756_s1 + $0x190] sm:$0xff]  ;;  %v1700_v45 = vld [vmem:[%s4756_s1 + $0x198] sm:$0xff] }
 0x21f   :  { %3627 = vmatprep.subr.bf16.mxu0 %v3876_v5 }
 0x222   :  { %3629 = vmatpush3.bf16.msra.mxu0 %v3628_v49  ;;  %v3721_v49 = vpack.c.bf16 %v1967_v48, %v1966_v47  ;;  %v1775_v47 = vld [vmem:[%s4756_s1 + $0x1a0] sm:$0xff]  ;;  %v1776_v48 = vld [vmem:[%s4756_s1 + $0x1a8] sm:$0xff] }
 0x223   :  { %3630 = vmatprep.subr.bf16.mxu0 %v3876_v5 }
 0x226   :  { %3632 = vmatpush3.bf16.msra.mxu0 %v3631_v52  ;;  %v3724_v52 = vpack.c.bf16 %v1969_v51, %v1968_v50  ;;  %v1777_v51 = vld [vmem:[%s4756_s1 + $0x1b0] sm:$0xff] }
 0x227   :  { %3633 = vmatprep.subr.bf16.mxu0 %v3876_v5 }
 0x22a   :  { %3635 = vmatpush3.bf16.msra.mxu0 %v3634_v55 }
 0x22b   :  { %3636 = vmatprep.subr.bf16.mxu0 %v3876_v5 }
 0x22e   :  { %3638 = vmatpush3.bf16.msra.mxu0 %v3637_v58 }
 0x22f   :  { %3639 = vmatprep.subr.bf16.mxu0 %v3876_v5 }
 0x232   :  { %3641 = vmatpush3.bf16.msra.mxu0 %v3640_v61 }
 0x233   :  { %3642 = vmatprep.subr.bf16.mxu0 %v3876_v5 }
 0x236   :  { %3644 = vmatpush3.bf16.msra.mxu0 %v3643_v0  ;;  %v1611_v0 = vld [vmem:[%s4756_s1 + $0x120] sm:$0xff] }
 0x237   :  { %3705 = vmatprep.subr.bf16.mxu0 %v3876_v5 }
 0x239   :  { %3232 = vmatmul.mubr.f32.vlgmr.msra.gmra.mrb[14].mxu0 %v1118_v43  ;;  %v3715_v43 = vpack.c.bf16 %v1963_v42, %v1962_v41  ;;  %v1697_v41 = vld [vmem:[%s4756_s1 + $0x180] sm:$0xff]  ;;  %v1698_v42 = vld [vmem:[%s4756_s1 + $0x188] sm:$0xff] }
 0x23a   :  { %3395 = vmatprep.mubr.msk.f32.mxu0 %vm3877_vm1, %v3878_v28  ;;  %3707 = vmatpush3.bf16.msra.mxu0 %v3706_v35 }
 0x23b   :  { %3708 = vmatprep.subr.bf16.mxu0 %v3876_v5 }
 0x23e   :  { %3710 = vmatpush3.bf16.msra.mxu0 %v3709_v37 }
 0x23f   :  { %3711 = vmatprep.subr.bf16.mxu0 %v3876_v5 }
 0x242   :  { %3713 = vmatpush3.bf16.msra.mxu0 %v3712_v40  ;;  %v3673_v40 = vpack.c.bf16 %v1696_v39, %v1695_v38  ;;  %v1952_v38 = vld [vmem:[%s4757_s2 + $0x1c8] sm:$0xff]  ;;  %v1953_v39 = vld [vmem:[%s4757_s2 + $0x1d0] sm:$0xff] }
 0x243   :  { %3714 = vmatprep.subr.bf16.mxu0 %v3876_v5 }
 0x246   :  { %3716 = vmatpush3.bf16.msra.mxu0 %v3715_v43  ;;  %v3676_v43 = vpack.c.bf16 %v1698_v42, %v1697_v41  ;;  %v1954_v41 = vld [vmem:[%s4757_s2 + $0x1d8] sm:$0xff]  ;;  %v1955_v42 = vld [vmem:[%s4757_s2 + $0x1e0] sm:$0xff] }
 0x247   :  { %3717 = vmatprep.subr.bf16.mxu0 %v3876_v5 }
 0x24a   :  { %3719 = vmatpush3.bf16.msra.mxu0 %v3718_v46  ;;  %v3679_v46 = vpack.c.bf16 %v1700_v45, %v1699_v44 }
 0x24b   :  { %3720 = vmatprep.subr.bf16.mxu0 %v3876_v5 }
 0x24e   :  { %3722 = vmatpush3.bf16.msra.mxu0 %v3721_v49  ;;  %v3682_v49 = vpack.c.bf16 %v1776_v48, %v1775_v47 }
 0x24f   :  { %3723 = vmatprep.subr.bf16.mxu0 %v3876_v5 }
 0x252   :  { %3725 = vmatpush3.bf16.msra.mxu0 %v3724_v52  ;;  %v1778_v52 = vld [vmem:[%s4756_s1 + $0x1b8] sm:$0xff] }
 0x253   :  { %3726 = vmatprep.subr.bf16.mxu0 %v3876_v5 }
 0x2ec   :  { %v1217_v1 = vpop.f32.mrb[12].mxu0 }
 0x2ed   :  { %v3198_v2 = vpop.f32.mrb[13].mxu0  ;;  %v1221_v3 = vand.u32 2147483647, %v1217_v1  ;;  %v1612_v1 = vld [vmem:[%s4756_s1 + $0x128] sm:$0xff] }
 0x30c   :  { %v1288_v4 = vpop.f32.mrb[14].mxu0 }
 0x30d   :  { %v1289_v6 = vadd.f32 %v1288_v4, %v1221_v3  ;;  %v3233_v7 = vpop.f32.mrb[15].mxu0 }
 0x30f   :  { %v1292_v8 = vmul.f32 0.5, %v1289_v6  ;;  %v3658_v6 = vpack.c.bf16 %v1612_v1, %v1611_v0  ;;  %v1859_v0 = vld [vmem:[%s4756_s1 + $0x1f0] sm:$0xff]  ;;  %v1860_v1 = vld [vmem:[%s4756_s1 + $0x1f8] sm:$0xff] }
 0x311   :  { %3235 = vmatpush3.msra.mxu1 %v1292_v8 }
 0x312   :  { %3237 = vmatmul.mubr.msk.f32.vlgmr.msra.gmra.mrb[2].mxu1 %vm1303_vm3, %v1298_v9  ;;  %3251 = vmatprep.subr.mxu1 %v3878_v28  ;;  %v1613_v9 = vld [vmem:[%s4756_s1 + $0x130] sm:$0xff] }
 0x313   :  { %3252 = vmatpush3.msra.mxu1 %v1292_v8  ;;  %3239 = vmatprep.mubr.msk.f32.mxu1 %vm3877_vm1, %v3878_v28 }
 0x314   :  { %3645 = vmatprep.subr.bf16.mxu1 %v3876_v5 }
 0x316   :  { %3240 = vmatmul.mubr.msk.f32.gmra.mrb[4].mxu1 %vm1303_vm3, %v1299_v10  ;;  %v1614_v10 = vld [vmem:[%s4756_s1 + $0x138] sm:$0xff] }
 0x317   :  { %3242 = vmatprep.mubr.msk.f32.mxu1 %vm3877_vm1, %v3878_v28 }
 0x31a   :  { %3243 = vmatmul.mubr.msk.f32.gmra.mrb[6].mxu1 %vm1303_vm3, %v1300_v11 }
 0x31b   :  { %3245 = vmatprep.mubr.msk.f32.mxu1 %vm3877_vm1, %v3878_v28 }
 0x31e   :  { %3246 = vmatmul.mubr.msk.f32.gmra.mrb[8].mxu1 %vm1303_vm3, %v1301_v12 }
 0x31f   :  { %3248 = vmatprep.mubr.msk.f32.mxu1 %vm3877_vm1, %v3878_v28 }
 0x322   :  { %3249 = vmatmul.mubr.msk.f32.gmra.mrb[10].mxu1 %vm1303_vm3, %v1302_v13 }
 0x323   :  { %3253 = vmatprep.mubr.msk.f32.mxu1 %vm3877_vm1, %v3878_v28 }
 0x326   :  { %3254 = vmatmul.mubr.msk.f32.vlgmr.msra.gmra.mrb[12].mxu1 %vm1303_vm3, %v1293_v14  ;;  %v3661_v14 = vpack.c.bf16 %v1614_v10, %v1613_v9 }
 0x327   :  { %3256 = vmatprep.mubr.msk.f32.mxu1 %vm3877_vm1, %v3878_v28  ;;  %3647 = vmatpush3.bf16.msra.mxu1 %v3646_v21 }
 0x328   :  { %3648 = vmatprep.subr.bf16.mxu1 %v3876_v5 }
 0x32a   :  { %3257 = vmatmul.mubr.msk.f32.gmra.mrb[14].mxu1 %vm1303_vm3, %v1294_v15 }
 0x32b   :  { %3259 = vmatprep.mubr.msk.f32.mxu1 %vm3877_vm1, %v3878_v28  ;;  %3650 = vmatpush3.bf16.msra.mxu1 %v3649_v24  ;;  %v1618_v24 = vld [vmem:[%s4756_s1 + $0x158] sm:$0xff] }
 0x32c   :  { %3651 = vmatprep.subr.bf16.mxu1 %v3876_v5  ;;  %v3667_v29 = vpack.c.bf16 %v1618_v24, %v1617_v23  ;;  %v1943_v23 = vld [vmem:[%s4757_s2 + $0x180] sm:$0xff] }
 0x32e   :  { %3260 = vmatmul.mubr.msk.f32.gmra.mrb[16].mxu1 %vm1303_vm3, %v1295_v16  ;;  %v1615_v16 = vld [vmem:[%s4756_s1 + $0x140] sm:$0xff] }
 0x32f   :  { %3262 = vmatprep.mubr.msk.f32.mxu1 %vm3877_vm1, %v3878_v28  ;;  %3653 = vmatpush3.bf16.msra.mxu1 %v3652_v27 }
 0x330   :  { %3654 = vmatprep.subr.bf16.mxu1 %v3876_v5 }
 0x332   :  { %3263 = vmatmul.mubr.msk.f32.gmra.mrb[18].mxu1 %vm1303_vm3, %v1296_v17  ;;  %v1616_v17 = vld [vmem:[%s4756_s1 + $0x148] sm:$0xff] }
 0x333   :  { %3265 = vmatprep.mubr.msk.f32.mxu1 %vm3877_vm1, %v3878_v28  ;;  %3656 = vmatpush3.bf16.msra.mxu1 %v3655_v31  ;;  %v3664_v21 = vpack.c.bf16 %v1616_v17, %v1615_v16  ;;  %v1693_v31 = vld [vmem:[%s4756_s1 + $0x160] sm:$0xff]  ;;  %v1941_v16 = vld [vmem:[%s4757_s2 + $0x170] sm:$0xff] }
 0x334   :  { %3657 = vmatprep.subr.bf16.mxu1 %v3876_v5  ;;  %v3670_v36 = vpack.c.bf16 %v1694_v32, %v1693_v31  ;;  %v1948_v32 = vld [vmem:[%s4757_s2 + $0x1a8] sm:$0xff] }
 0x336   :  { %3266 = vmatmul.mubr.msk.f32.gmra.mrb[20].mxu1 %vm1303_vm3, %v1297_v18 }
 0x337   :  { %3284 = vmatprep.mubr.msk.f32.mxu1 %vm3877_vm1, %v3878_v28 }
 0x3e5   :  { %v1385_v53 = vpop.f32.mrb[2].mxu1 }
 0x3e6   :  { %v3238_v54 = vpop.f32.mrb[3].mxu1  ;;  %v1409_v63 = vand.u32 2147483647, %v1385_v53  ;;  %v3685_v53 = vpack.c.bf16 %v1778_v52, %v1777_v51  ;;  %v2116_v51 = vld [vmem:[%s4758_s3 + $0x58] sm:$0x1]  ;;  %v2265_v52 = vld [vmem:[%s4756_s1 + $0x220] sm:$0xff] }
 0x3e7   :  { %v1779_v54 = vld [vmem:[%s4756_s1 + $0x1c0] sm:$0xff] }
 0x3e9   :  { %v1390_v55 = vpop.f32.mrb[4].mxu1 }
 0x3ea   :  { %v3241_v56 = vpop.f32.mrb[5].mxu1  ;;  %v1410_v7 = vand.u32 2147483647, %v1390_v55  ;;  %v1780_v55 = vld [vmem:[%s4756_s1 + $0x1c8] sm:$0xff] }
 0x3eb   :  { %v3688_v56 = vpack.c.bf16 %v1780_v55, %v1779_v54  ;;  %v2348_v54 = vld [vmem:[%s4758_s3 + $0x59] sm:$0x1]  ;;  %v2115_v55 = vld [vmem:[%s4758_s3 + $0x50] sm:$0x1] }
 0x3ed   :  { %v1395_v57 = vpop.f32.mrb[6].mxu1 }
 0x3ee   :  { %v3244_v58 = vpop.f32.mrb[7].mxu1  ;;  %v1411_v15 = vand.u32 2147483647, %v1395_v57  ;;  %v1781_v57 = vld [vmem:[%s4756_s1 + $0x1d0] sm:$0xff] }
 0x3ef   :  { %v1782_v58 = vld [vmem:[%s4756_s1 + $0x1d8] sm:$0xff] }
 0x3f1   :  { %v1400_v59 = vpop.f32.mrb[8].mxu1 }
 0x3f2   :  { %v3247_v60 = vpop.f32.mrb[9].mxu1  ;;  %v1412_v22 = vand.u32 2147483647, %v1400_v59  ;;  %v3691_v59 = vpack.c.bf16 %v1782_v58, %v1781_v57  ;;  %v2267_v57 = vld [vmem:[%s4756_s1 + $0x230] sm:$0xff]  ;;  %v2268_v58 = vld [vmem:[%s4756_s1 + $0x238] sm:$0xff] }
 0x3f3   :  { %v1857_v60 = vld [vmem:[%s4756_s1 + $0x1e0] sm:$0xff] }
 0x3f5   :  { %v1405_v61 = vpop.f32.mrb[10].mxu1 }
 0x3f6   :  { %v3250_v62 = vpop.f32.mrb[11].mxu1  ;;  %v1413_v30 = vand.u32 2147483647, %v1405_v61  ;;  %v1858_v61 = vld [vmem:[%s4756_s1 + $0x1e8] sm:$0xff] }
 0x3f7   :  { %v3694_v62 = vpack.c.bf16 %v1858_v61, %v1857_v60  ;;  %v3757_v60 = vpack.c.bf16 %v2268_v58, %v2267_v57  ;;  %v2269_v61 = vld [vmem:[%s4756_s1 + $0x240] sm:$0xff]  ;;  %v2671_v58 = vld [vmem:[%s4756_s1 + $0x2b8] sm:$0xff] }
 0x3f9   :  { %v1495_v2 = vpop.f32.mrb[12].mxu1 }
 0x3fa   :  { %v1496_v3 = vadd.f32 %v1495_v2, %v1409_v63  ;;  %v3255_v4 = vpop.f32.mrb[13].mxu1  ;;  %v3697_v2 = vpack.c.bf16 %v1860_v1, %v1859_v0  ;;  %v2271_v0 = vld [vmem:[%s4756_s1 + $0x250] sm:$0xff]  ;;  %v2272_v1 = vld [vmem:[%s4756_s1 + $0x258] sm:$0xff] }
 0x3fb   :  { %v1862_v4 = vld [vmem:[%s4756_s1 + $0x208] sm:$0xff] }
 0x3fc   :  { %v1519_v8 = vmul.f32 0.5, %v1496_v3  ;;  %v1861_v3 = vld [vmem:[%s4756_s1 + $0x200] sm:$0xff] }
 0x3fd   :  { %v1500_v11 = vpop.f32.mrb[14].mxu1 }
 0x3fe   :  { %v1501_v12 = vadd.f32 %v1500_v11, %v1410_v7  ;;  %3285 = vmatmul.mubr.msk.f32.vlgmr.msra.gmra.mrb[22].mxu1 %vm38_vm0, %v1519_v8  ;;  %v3258_v13 = vpop.f32.mrb[15].mxu1  ;;  %v1863_v7 = vld [vmem:[%s4756_s1 + $0x210] sm:$0xff]  ;;  %v1864_v8 = vld [vmem:[%s4756_s1 + $0x218] sm:$0xff] }
 0x3ff   :  { %3659 = vmatpush3.bf16.msra.mxu1 %v3658_v6  ;;  %3303 = vmatprep.mubr.msk.f32.mxu1 %vm3877_vm1, %v3878_v28  ;;  %v3700_v6 = vpack.c.bf16 %v1862_v4, %v1861_v3  ;;  %v3703_v9 = vpack.c.bf16 %v1864_v8, %v1863_v7  ;;  %v1970_v11 = vld [vmem:[%s4757_s2 + $0x258] sm:$0xff]  ;;  %v2580_v3 = vld [vmem:[%s4757_s2 + $0x268] sm:$0xff]  ;;  %v2581_v4 = vld [vmem:[%s4757_s2 + $0x270] sm:$0xff] }
 0x400   :  { %3660 = vmatprep.subr.bf16.mxu1 %v3876_v5  ;;  %v1520_v37 = vmul.f32 0.5, %v1501_v12  ;;  %v1971_v12 = vld [vmem:[%s4757_s2 + $0x260] sm:$0xff]  ;;  %v3778_v7 = vpack.c.bf16 %v2581_v4, %v2580_v3  ;;  %v2674_v4 = vld [vmem:[%s4756_s1 + $0x2d0] sm:$0xff] }
 0x401   :  { %v1505_v18 = vpop.f32.mrb[16].mxu1  ;;  %v3727_v13 = vpack.c.bf16 %v1971_v12, %v1970_v11  ;;  %v2583_v8 = vld [vmem:[%s4757_s2 + $0x280] sm:$0xff]  ;;  %v2585_v11 = vld [vmem:[%s4757_s2 + $0x290] sm:$0xff] }
 0x402   :  { %v1506_v19 = vadd.f32 %v1505_v18, %v1411_v15  ;;  %v3261_v20 = vpop.f32.mrb[17].mxu1  ;;  %v1940_v15 = vld [vmem:[%s4757_s2 + $0x168] sm:$0xff] }
 0x403   :  { %3662 = vmatpush3.bf16.msra.mxu1 %v3661_v14  ;;  %3728 = vmatpush3.bf16.msra.mxu0 %v3727_v13  ;;  %v2801_v14 = vld [vmem:[%s4756_s1 + $0x8] ss:$0 sm:$0xff]  ;;  %v3730_v20 = vpack.c.bf16 %v1941_v16, %v1940_v15  ;;  %v2586_v13 = vld [vmem:[%s4757_s2 + $0x298] sm:$0xff] }
 0x404   :  { %3663 = vmatprep.subr.bf16.mxu1 %v3876_v5  ;;  %v1521_v50 = vmul.f32 0.5, %v1506_v19  ;;  %3729 = vmatprep.subr.bf16.mxu0 %v3876_v5  ;;  %v2588_v16 = vld [vmem:[%s4757_s2 + $0x2a8] sm:$0xff] }
 0x405   :  { %v1510_v25 = vpop.f32.mrb[18].mxu1 }
 0x406   :  { %v1511_v26 = vadd.f32 %v1510_v25, %v1412_v22  ;;  %v3264_v27 = vpop.f32.mrb[19].mxu1  ;;  %v1942_v22 = vld [vmem:[%s4757_s2 + $0x178] sm:$0xff]  ;;  %v1944_v25 = vld [vmem:[%s4757_s2 + $0x188] sm:$0xff] }
 0x407   :  { %3665 = vmatpush3.bf16.msra.mxu1 %v3664_v21  ;;  %v3733_v24 = vpack.c.bf16 %v1943_v23, %v1942_v22  ;;  %v2592_v22 = vld [vmem:[%s4757_s2 + $0x2c8] sm:$0xff]  ;;  %v2593_v23 = vld [vmem:[%s4757_s2 + $0x2d0] sm:$0xff] }
 0x408   :  { %3666 = vmatprep.subr.bf16.mxu1 %v3876_v5  ;;  %v1522_v63 = vmul.f32 0.5, %v1511_v26  ;;  %v1945_v26 = vld [vmem:[%s4757_s2 + $0x190] sm:$0xff] }
 0x409   :  { %v1515_v33 = vpop.f32.mrb[20].mxu1  ;;  %v3736_v27 = vpack.c.bf16 %v1945_v26, %v1944_v25 }
 0x40a   :  { %v4397_v34 = vadd.f32 %v1515_v33, %v1413_v30  ;;  %v3267_v35 = vpop.f32.mrb[21].mxu1  ;;  %v1947_v30 = vld [vmem:[%s4757_s2 + $0x1a0] sm:$0xff]  ;;  %v1949_v33 = vld [vmem:[%s4757_s2 + $0x1b0] sm:$0xff] }
 0x40b   :  { %3668 = vmatpush3.bf16.msra.mxu1 %v3667_v29  ;;  %v1946_v29 = vld [vmem:[%s4757_s2 + $0x198] sm:$0xff] }
 0x40c   :  { %3669 = vmatprep.subr.bf16.mxu1 %v3876_v5  ;;  %v1523_v10 = vmul.f32 0.5, %v4397_v34  ;;  %v3739_v31 = vpack.c.bf16 %v1947_v30, %v1946_v29  ;;  %v3742_v34 = vpack.c.bf16 %v1949_v33, %v1948_v32  ;;  %v1950_v35 = vld [vmem:[%s4757_s2 + $0x1b8] sm:$0xff] }
 0x40e   :  { %3304 = vmatmul.mubr.msk.f32.vlgmr.msra.gmra.mrb[22].mxu1 %vm38_vm0, %v1520_v37 }
 0x40f   :  { %3671 = vmatpush3.bf16.msra.mxu1 %v3670_v36  ;;  %3322 = vmatprep.mubr.msk.f32.mxu1 %vm3877_vm1, %v3878_v28  ;;  %v1951_v36 = vld [vmem:[%s4757_s2 + $0x1c0] sm:$0xff] }
 0x410   :  { %3672 = vmatprep.subr.bf16.mxu1 %v3876_v5  ;;  %v3745_v37 = vpack.c.bf16 %v1951_v36, %v1950_v35 }
 0x413   :  { %3674 = vmatpush3.bf16.msra.mxu1 %v3673_v40  ;;  %v3748_v40 = vpack.c.bf16 %v1953_v39, %v1952_v38 }
 0x414   :  { %3675 = vmatprep.subr.bf16.mxu1 %v3876_v5 }
 0x417   :  { %3677 = vmatpush3.bf16.msra.mxu1 %v3676_v43  ;;  %v3751_v43 = vpack.c.bf16 %v1955_v42, %v1954_v41  ;;  %v2500_v41 = vld [vmem:[%s4756_s1 + $0x278] sm:$0xff] }
 0x418   :  { %3678 = vmatprep.subr.bf16.mxu1 %v3876_v5 }
 0x41b   :  { %3680 = vmatpush3.bf16.msra.mxu1 %v3679_v46 }
 0x41c   :  { %3681 = vmatprep.subr.bf16.mxu1 %v3876_v5 }
 0x41e   :  { %3323 = vmatmul.mubr.msk.f32.vlgmr.msra.gmra.mrb[22].mxu1 %vm38_vm0, %v1521_v50 }
 0x41f   :  { %3683 = vmatpush3.bf16.msra.mxu1 %v3682_v49  ;;  %3341 = vmatprep.mubr.msk.f32.mxu1 %vm3877_vm1, %v3878_v28 }
 0x420   :  { %3684 = vmatprep.subr.bf16.mxu1 %v3876_v5 }
 0x423   :  { %3686 = vmatpush3.bf16.msra.mxu1 %v3685_v53  ;;  %v2266_v53 = vld [vmem:[%s4756_s1 + $0x228] sm:$0xff] }
 0x424   :  { %3687 = vmatprep.subr.bf16.mxu1 %v3876_v5 }
 0x427   :  { %3689 = vmatpush3.bf16.msra.mxu1 %v3688_v56  ;;  %v3754_v56 = vpack.c.bf16 %v2266_v53, %v2265_v52  ;;  %v2594_v52 = vld [vmem:[%s4757_s2 + $0x2d8] sm:$0xff]  ;;  %v2595_v53 = vld [vmem:[%s4757_s2 + $0x2e0] sm:$0xff] }
 0x428   :  { %3690 = vmatprep.subr.bf16.mxu1 %v3876_v5 }
 0x42b   :  { %3692 = vmatpush3.bf16.msra.mxu1 %v3691_v59  ;;  %v2347_v59 = vld [vmem:[%s4758_s3 + $0x51] sm:$0x1] }
 0x42c   :  { %3693 = vmatprep.subr.bf16.mxu1 %v3876_v5 }
 0x42e   :  { %3342 = vmatmul.mubr.msk.f32.vlgmr.msra.gmra.mrb[22].mxu1 %vm38_vm0, %v1522_v63 }
 0x42f   :  { %3695 = vmatpush3.bf16.msra.mxu1 %v3694_v62  ;;  %3360 = vmatprep.mubr.msk.f32.mxu1 %vm3877_vm1, %v3878_v28  ;;  %v2270_v62 = vld [vmem:[%s4756_s1 + $0x248] sm:$0xff] }
 0x430   :  { %3696 = vmatprep.subr.bf16.mxu1 %v3876_v5  ;;  %v3760_v63 = vpack.c.bf16 %v2270_v62, %v2269_v61  ;;  %v2673_v61 = vld [vmem:[%s4756_s1 + $0x2c8] sm:$0xff] }
 0x433   :  { %3698 = vmatpush3.bf16.msra.mxu1 %v3697_v2  ;;  %v3763_v2 = vpack.c.bf16 %v2272_v1, %v2271_v0 }
 0x434   :  { %3699 = vmatprep.subr.bf16.mxu1 %v3876_v5 }
 0x437   :  { %3701 = vmatpush3.bf16.msra.mxu1 %v3700_v6  ;;  %v2582_v6 = vld [vmem:[%s4757_s2 + $0x278] sm:$0xff] }
 0x438   :  { %3702 = vmatprep.subr.bf16.mxu1 %v3876_v5 }
 0x43b   :  { %3704 = vmatpush3.bf16.msra.mxu1 %v3703_v9  ;;  %v3781_v9 = vpack.c.bf16 %v2583_v8, %v2582_v6  ;;  %v2675_v6 = vld [vmem:[%s4756_s1 + $0x2d8] sm:$0xff] }
 0x43c   :  { %3462 = vmatprep.subr.mxu1 %v3878_v28 }
 0x43e   :  { %3361 = vmatmul.mubr.msk.f32.vlgmr.msra.gmra.mrb[22].mxu1 %vm38_vm0, %v1523_v10  ;;  %v2584_v10 = vld [vmem:[%s4757_s2 + $0x288] sm:$0xff] }
 0x43f   :  { %3464 = vmatprep.mubr.msk.f32.mxu1 %vm3877_vm1, %v3878_v28  ;;  %v3784_v12 = vpack.c.bf16 %v2585_v11, %v2584_v10 }
 0x511   :  { %v1934_v17 = vpop.f32.mrb[22].mxu1 }
 0x512   :  { %v3814_v18 = vadd.f32 %v2801_v14, %v1934_v17  ;;  %v3362_v19 = vpop.f32.mrb[23].mxu1  ;;  %v2587_v14 = vld [vmem:[%s4757_s2 + $0x2a0] sm:$0xff]  ;;  %v2589_v17 = vld [vmem:[%s4757_s2 + $0x2b0] sm:$0xff] }
 0x513   :  { %v3787_v15 = vpack.c.bf16 %v2587_v14, %v2586_v13  ;;  %v2590_v19 = vld [vmem:[%s4757_s2 + $0x2b8] sm:$0xff] }
 0x514   :  { %v1939_v21 = vmax.f32 %v3814_v18, 0.0  ;;  %v3790_v18 = vpack.c.bf16 %v2589_v17, %v2588_v16 }
 0x516   :  { %3396 = vmatmul.mubr.f32.vlgmr.msra.gmra.mrb[16].mxu0 %v1939_v21 }
 0x517   :  { %3731 = vmatpush3.bf16.msra.mxu0 %v3730_v20  ;;  %3430 = vmatprep.mubr.msk.f32.mxu0 %vm3877_vm1, %v3878_v28  ;;  %v2591_v20 = vld [vmem:[%s4757_s2 + $0x2c0] sm:$0xff] }
 0x518   :  { %3732 = vmatprep.subr.bf16.mxu0 %v3876_v5 }
 0x51b   :  { %3734 = vmatpush3.bf16.msra.mxu0 %v3733_v24  ;;  %v3796_v24 = vpack.c.bf16 %v2593_v23, %v2592_v22 }
 0x51c   :  { %3735 = vmatprep.subr.bf16.mxu0 %v3876_v5 }
 0x51f   :  { %3737 = vmatpush3.bf16.msra.mxu0 %v3736_v27  ;;  %v2497_v27 = vld [vmem:[%s4756_s1 + $0x260] sm:$0xff] }
 0x520   :  { %3738 = vmatprep.subr.bf16.mxu0 %v3876_v5 }
 0x523   :  { %3740 = vmatpush3.bf16.msra.mxu0 %v3739_v31  ;;  %v2498_v31 = vld [vmem:[%s4756_s1 + $0x268] sm:$0xff] }
 0x524   :  { %3741 = vmatprep.subr.bf16.mxu0 %v3876_v5 }
 0x527   :  { %3743 = vmatpush3.bf16.msra.mxu0 %v3742_v34 }
 0x528   :  { %3744 = vmatprep.subr.bf16.mxu0 %v3876_v5 }
 0x52b   :  { %3746 = vmatpush3.bf16.msra.mxu0 %v3745_v37  ;;  %v3766_v37 = vpack.c.bf16 %v2498_v31, %v2497_v27 }
 0x52c   :  { %3747 = vmatprep.subr.bf16.mxu0 %v3876_v5 }
 0x52f   :  { %3749 = vmatpush3.bf16.msra.mxu0 %v3748_v40  ;;  %v2499_v40 = vld [vmem:[%s4756_s1 + $0x270] sm:$0xff] }
 0x530   :  { %3750 = vmatprep.subr.bf16.mxu0 %v3876_v5 }
 0x533   :  { %3752 = vmatpush3.bf16.msra.mxu0 %v3751_v43 }
 0x534   :  { %3433 = vmatprep.subr.mxu0 %v3878_v28 }
 0x536   :  { %3431 = vmatmul.mubr.f32.vlgmr.msra.gmra.mrb[18].mxu0 %v1939_v21  ;;  %v3793_v21 = vpack.c.bf16 %v2591_v20, %v2590_v19 }
 0x537   :  { %3435 = vmatprep.mubr.msk.f32.mxu0 %vm3877_vm1, %v3878_v28 }
 0x5e9   :  { %v2038_v44 = vpop.f32.mrb[16].mxu0 }
 0x5ea   :  { %v3397_v45 = vpop.f32.mrb[17].mxu0  ;;  %v2042_v46 = vand.u32 2147483647, %v2038_v44  ;;  %v3769_v44 = vpack.c.bf16 %v2500_v41, %v2499_v40 }
 0x5eb   :  { %v2501_v45 = vld [vmem:[%s4756_s1 + $0x280] sm:$0xff] }
 0x609   :  { %v2109_v47 = vpop.f32.mrb[18].mxu0 }
 0x60a   :  { %v2110_v48 = vadd.f32 %v2109_v47, %v2042_v46  ;;  %v3432_v49 = vpop.f32.mrb[19].mxu0  ;;  %v2502_v46 = vld [vmem:[%s4756_s1 + $0x288] sm:$0xff] }
 0x60b   :  { %v3772_v47 = vpack.c.bf16 %v2502_v46, %v2501_v45  ;;  %v2504_v49 = vld [vmem:[%s4756_s1 + $0x298] sm:$0xff] }
 0x60c   :  { %v2113_v50 = vmul.f32 0.5, %v2110_v48  ;;  %v2503_v48 = vld [vmem:[%s4756_s1 + $0x290] sm:$0xff] }
 0x60e   :  { %3434 = vmatpush3.msra.mxu0 %v2113_v50  ;;  %3463 = vmatpush3.msra.mxu1 %v2113_v50 }
 0x60f   :  { %3436 = vmatmul.mubr.msk.f32.vlgmr.msra.gmra.mrb[20].mxu0 %vm1303_vm3, %v2116_v51  ;;  %3438 = vmatprep.subr.mxu0 %v3878_v28 }
 0x610   :  { %3467 = vmatprep.subr.mxu1 %v3878_v28  ;;  %3439 = vmatpush3.msra.mxu0 %v2113_v50 }
 0x611   :  { %3465 = vmatmul.mubr.msk.f32.vlgmr.msra.gmra.mrb[24].mxu1 %vm1303_vm3, %v2348_v54  ;;  %3440 = vmatprep.mubr.msk.f32.mxu0 %vm3877_vm1, %v3878_v28  ;;  %v3799_v54 = vpack.c.bf16 %v2595_v53, %v2594_v52 }
 0x612   :  { %3468 = vmatpush3.msra.mxu1 %v2113_v50  ;;  %3469 = vmatprep.mubr.msk.f32.mxu1 %vm3877_vm1, %v3878_v28  ;;  %v3775_v50 = vpack.c.bf16 %v2504_v49, %v2503_v48 }
 0x613   :  { %3441 = vmatmul.mubr.msk.f32.vlgmr.msra.gmra.mrb[22].mxu0 %vm1303_vm3, %v2115_v55  ;;  %3753 = vmatprep.subr.bf16.mxu0 %v3876_v5  ;;  %v2668_v55 = vld [vmem:[%s4756_s1 + $0x2a0] sm:$0xff] }
 0x614   :  { %3755 = vmatpush3.bf16.msra.mxu0 %v3754_v56  ;;  %3459 = vmatprep.mubr.msk.f32.mxu0 %vm3877_vm1, %v3878_v28  ;;  %v2669_v56 = vld [vmem:[%s4756_s1 + $0x2a8] sm:$0xff] }
 0x615   :  { %3470 = vmatmul.mubr.msk.f32.vlgmr.msra.gmra.mrb[26].mxu1 %vm1303_vm3, %v2347_v59  ;;  %3756 = vmatprep.subr.bf16.mxu0 %v3876_v5  ;;  %v3802_v57 = vpack.c.bf16 %v2669_v56, %v2668_v55 }
 0x616   :  { %3777 = vmatprep.subr.bf16.mxu1 %v3876_v5  ;;  %3523 = vmatprep.mubr.msk.f32.mxu1 %vm3877_vm1, %v3878_v28 }
 0x617   :  { %3779 = vmatpush3.bf16.msra.mxu1 %v3778_v7  ;;  %v3811_v7 = vpack.c.bf16 %v2675_v6, %v2674_v4 }
 0x618   :  { %3758 = vmatpush3.bf16.msra.mxu0 %v3757_v60  ;;  %3780 = vmatprep.subr.bf16.mxu1 %v3876_v5  ;;  %v2672_v60 = vld [vmem:[%s4756_s1 + $0x2c0] sm:$0xff] }
 0x619   :  { %3759 = vmatprep.subr.bf16.mxu0 %v3876_v5  ;;  %v3808_v62 = vpack.c.bf16 %v2673_v61, %v2672_v60 }
 0x61b   :  { %3782 = vmatpush3.bf16.msra.mxu1 %v3781_v9 }
 0x61c   :  { %3761 = vmatpush3.bf16.msra.mxu0 %v3760_v63  ;;  %3783 = vmatprep.subr.bf16.mxu1 %v3876_v5  ;;  %v2114_v63 = vld [vmem:[%s4756_s1 + $0x10] sm:$0x1] }
 0x61d   :  { %3762 = vmatprep.subr.bf16.mxu0 %v3876_v5 }
 0x61f   :  { %3785 = vmatpush3.bf16.msra.mxu1 %v3784_v12  ;;  %v2676_v12 = vld [vmem:[%s4756_s1 + $0x18] sm:$0x1] }
 0x620   :  { %3764 = vmatpush3.bf16.msra.mxu0 %v3763_v2  ;;  %3786 = vmatprep.subr.bf16.mxu1 %v3876_v5 }
 0x621   :  { %3765 = vmatprep.subr.bf16.mxu0 %v3876_v5 }
 0x623   :  { %3788 = vmatpush3.bf16.msra.mxu1 %v3787_v15 }
 0x624   :  { %3789 = vmatprep.subr.bf16.mxu1 %v3876_v5 }
 0x627   :  { %3791 = vmatpush3.bf16.msra.mxu1 %v3790_v18 }
 0x628   :  { %3792 = vmatprep.subr.bf16.mxu1 %v3876_v5 }
 0x62b   :  { %3794 = vmatpush3.bf16.msra.mxu1 %v3793_v21 }
 0x62c   :  { %3795 = vmatprep.subr.bf16.mxu1 %v3876_v5 }
 0x62f   :  { %3797 = vmatpush3.bf16.msra.mxu1 %v3796_v24 }
 0x630   :  { %3798 = vmatprep.subr.bf16.mxu1 %v3876_v5 }
 0x633   :  { %3800 = vmatpush3.bf16.msra.mxu1 %v3799_v54 }
 0x6e2   :  { %v2186_v25 = vpop.f32.mrb[20].mxu0 }
 0x6e3   :  { %v3437_v26 = vpop.f32.mrb[21].mxu0  ;;  %v2190_v30 = vand.u32 2147483647, %v2186_v25 }
 0x6e4   :  { %v2418_v29 = vpop.f32.mrb[24].mxu1 }
 0x6e5   :  { %v2422_v32 = vand.u32 2147483647, %v2418_v29  ;;  %v3466_v33 = vpop.f32.mrb[25].mxu1 }
 0x6e6   :  { %v2260_v34 = vpop.f32.mrb[22].mxu0 }
 0x6e7   :  { %v2261_v35 = vadd.f32 %v2260_v34, %v2190_v30  ;;  %v3442_v36 = vpop.f32.mrb[23].mxu0 }
 0x6e8   :  { %v2492_v38 = vpop.f32.mrb[26].mxu1 }
 0x6e9   :  { %v2264_v39 = vmul.f32 0.5, %v2261_v35  ;;  %v2493_v42 = vadd.f32 %v2492_v38, %v2422_v32  ;;  %v3471_v43 = vpop.f32.mrb[27].mxu1 }
 0x6eb   :  { %3460 = vmatmul.mubr.msk.f32.vlgmr.msra.gmra.mrb[24].mxu0 %vm38_vm0, %v2264_v39  ;;  %v2496_v51 = vmul.f32 0.5, %v2493_v42 }
 0x6ec   :  { %3767 = vmatpush3.bf16.msra.mxu0 %v3766_v37  ;;  %3488 = vmatprep.mubr.msk.f32.mxu0 %vm3877_vm1, %v3878_v28 }
 0x6ed   :  { %3768 = vmatprep.subr.bf16.mxu0 %v3876_v5 }
 0x6f0   :  { %3770 = vmatpush3.bf16.msra.mxu0 %v3769_v44 }
 0x6f1   :  { %3771 = vmatprep.subr.bf16.mxu0 %v3876_v5 }
 0x6f4   :  { %3773 = vmatpush3.bf16.msra.mxu0 %v3772_v47 }
 0x6f5   :  { %3774 = vmatprep.subr.bf16.mxu0 %v3876_v5 }
 0x6f8   :  { %3776 = vmatpush3.bf16.msra.mxu0 %v3775_v50 }
 0x6f9   :  { %3801 = vmatprep.subr.bf16.mxu0 %v3876_v5 }
 0x6fb   :  { %3489 = vmatmul.mubr.msk.f32.vlgmr.msra.gmra.mrb[24].mxu0 %vm38_vm0, %v2496_v51 }
 0x6fc   :  { %3542 = vmatprep.mubr.msk.f32.mxu0 %vm3877_vm1, %v3878_v28  ;;  %v2670_v28 = vld [vmem:[%s4756_s1 + $0x2b0] sm:$0xff]  ;;  %3803 = vmatpush3.bf16.msra.mxu0 %v3802_v57 }
 0x6fd   :  { %v3805_v59 = vpack.c.bf16 %v2671_v58, %v2670_v28  ;;  %3804 = vmatprep.subr.bf16.mxu0 %v3876_v5 }
 0x700   :  { %3806 = vmatpush3.bf16.msra.mxu0 %v3805_v59 }
 0x701   :  { %3807 = vmatprep.subr.bf16.mxu0 %v3876_v5 }
 0x704   :  { %3809 = vmatpush3.bf16.msra.mxu0 %v3808_v62 }
 0x705   :  { %3810 = vmatprep.subr.bf16.mxu0 %v3876_v5  ;;  %v2596_v5 = vld [vmem:[%s4757_s2] sm:$0x1]  ;;  %s3856_s2 = scalar_lea.vmem %s2758_s22, 32 }
 0x706   :  { %p3858_p2 = scmp.lt.s32.totalorder %s3856_s2, %s3852_s23 }
 0x708   :  { %3812 = vmatpush3.bf16.msra.mxu0 %v3811_v7  ;;  %p3859_p3 = por %p3858_p2, %p3857_p1 }
 0x70a   :  { %p3860_p4 = pnand %p3859_p3, %p3853_p0 }
 0x7ce   :  { %v2574_v0 = vpop.f32.mrb[24].mxu0 }
 0x7cf   :  { %v3815_v1 = vadd.f32 %v2574_v0, %v2114_v63  ;;  %v3490_v2 = vpop.f32.mrb[25].mxu0 }
 0x7d1   :  { %v2579_v3 = vmax.f32 %v3815_v1, 0.0 }
 0x7d3   :  { %3524 = vmatmul.mubr.f32.vlgmr.msra.gmra.mrb[28].mxu1 %v2579_v3 }
 0x8a6   :  { %v2663_v8 = vpop.f32.mrb[28].mxu1 }
 0x8a7   :  { %v2664_v9 = vadd.f32 %v2663_v8, %v2596_v5  ;;  %v3525_v10 = vpop.f32.mrb[29].mxu1 }
 0x8a9   :  { %v2667_v11 = vmax.f32 %v2664_v9, 0.0 }
 0x8ab   :  { %3543 = vmatmul.mubr.msk.f32.vlgmr.msra.gmra.mrb[26].mxu0 %vm38_vm0, %v2667_v11 }
 0x97e   :  { %v2746_v13 = vpop.f32.mrb[26].mxu0 }
 0x97f   :  { %v2747_v14 = vadd.f32 %v2746_v13, %v2676_v12  ;;  %v3544_v15 = vpop.f32.mrb[27].mxu0 }
 0x981   :  { %2750 = vst [vmem:[#allocation2] sm:$0x1] %v2747_v14 }
 0x982   :  { %3863 = shalt.err (!%p3860_p4)
}
 0x983   :  { %s3864_s26 = scalar_lea.hbm %s4759_s4, 16 }
 0x984   :  { %p3865_p5 = scmp.ne.s32.totalorder %s4759_s4, %s3864_s26  ;;  %p3868_p6 = scmp.lt.u32.totalorder %s3864_s26, %s4759_s4 }
 0x986   :  { %p3870_p7 = pnand %p3868_p6, %p3865_p5 }
 0x988   :  { %3873 = shalt.err (!%p3870_p7)
}
 0x989   :  { %2760 = dma.vmem_to_hbm [thread:$0]  %s2758_s22, 16, %s4759_s4, [#allocation3]  }
 0x98a   :  { %3874 = dma.done.wait [#allocation3], 16  }
 0x98b   :  { %3875 = vsyncadd [#allocation3], 4294967280 }
 0x98c   :  { %2764 = vsyncpa [#allocation3], 1 }

</bundles_post_ra>
